<compile_context>
chip_gen: v5e
topology: v5e:2x2
jax: 0.10.0
libtpu: 0.0.40
codegen_flags: <defaults>
</compile_context>

<pallas_src>
import jax
import jax.numpy as jnp
from jax.experimental import pallas as pl
from jax.experimental.pallas import tpu as pltpu


def _vcdn_kernel(x_ref, e_ref, w1_ref, b1_ref, w2_ref, b2_ref, o_ref):
    """One batch tile of the fused VCDN forward."""
    x = x_ref[...]                                           # (TB, V*C) f32

    # Numerically stable log-sigmoid (exp/log run on the EUP slot).
    log_s = jnp.minimum(x, 0.0) - jnp.log(1.0 + jnp.exp(-jnp.abs(x)))

    # Cross-view outer product in log domain: one K = V*C matmul, then exp.
    # feat[b, n] = prod_v sigmoid(x_v)[b, digit_v(n)]  -> (TB, C**V), f32.
    feat = jnp.exp(jnp.dot(log_s, e_ref[...],
                           preferred_element_type=jnp.float32))

    # Linear(C**V -> H) + LeakyReLU(0.25).  MXU operands follow the stored
    # weight dtype (bf16 halves the dominant W1 DMA); accumulation is f32.
    h = jnp.dot(feat.astype(w1_ref.dtype), w1_ref[...],
                preferred_element_type=jnp.float32) + b1_ref[...]
    h = jnp.where(h >= 0.0, h, 0.25 * h)

    # Linear(H -> C), columns zero-padded to a lane-dense width.
    out = jnp.dot(h.astype(w2_ref.dtype), w2_ref[...],
                  preferred_element_type=jnp.float32) + b2_ref[...]
    o_ref[...] = out.astype(o_ref.dtype)


def _stacked_expansion(num_cls, num_view, dtype=jnp.float32):
    """E[v*C + c, n] = 1 iff digit v of n (base C, V digits, MSB first) == c.

    With this matrix, exp(log_sigmoid(x_packed) @ E) reproduces the PyTorch
    chained outer-product / reshape feature (digit order matches the reshape
    order in the reference forward)."""
    n = jnp.arange(num_cls ** num_view)
    c = jnp.arange(num_cls)
    blocks = []
    for v in range(num_view):
        digit = (n // (num_cls ** (num_view - 1 - v))) % num_cls
        blocks.append(digit[None, :] == c[:, None])
    return jnp.concatenate(blocks, axis=0).astype(dtype)


def vcdn_forward(in_list, w1, b1, w2, b2, hi_list=None, *, block_b=128):
    """Pallas implementation of VCDN.forward.

    in_list : list of V arrays, each (B, C) f32 pre-sigmoid view logits.
    w1      : (C**V, H)  — transposed vs nn.Linear.weight; f32 or bf16.
    b1      : (H,) f32
    w2      : (H, C)     — f32 or bf16.
    b2      : (C,) f32
    hi_list : accepted for API parity with the PyTorch module; unused (as in
              the original forward).
    block_b : batch rows per grid step (128 everywhere; 256 also good on
              v6e/v7x).
    """
    del hi_list  # unused by the reference forward as well
    num_view = len(in_list)
    batch, num_cls = in_list[0].shape
    feat_dim = num_cls ** num_view
    hdim = w1.shape[1]
    assert w1.shape == (feat_dim, hdim)
    assert b1.shape == (hdim,)
    assert w2.shape == (hdim, num_cls)
    assert b2.shape == (num_cls,)
    for v in in_list:
        assert v.shape == (batch, num_cls)

    vc = num_view * num_cls
    cls_pad = ((num_cls + 127) // 128) * 128
    block_b = max(8, block_b - block_b % 8)
    batch_pad = ((batch + block_b - 1) // block_b) * block_b
    grid = (batch_pad // block_b,)

    # One packed (B, V*C) operand for all views; pad batch up to the tile.
    x_packed = jnp.concatenate([v.astype(jnp.float32) for v in in_list], axis=1)
    if batch_pad != batch:
        x_packed = jnp.pad(x_packed, ((0, batch_pad - batch), (0, 0)))

    # Static stacked 0/1 expansion matrix (layout plumbing, built once here).
    e_mat = _stacked_expansion(num_cls, num_view, jnp.float32)

    # Lane-dense output: zero-pad W2 / b2 to a multiple of 128 columns.
    w2_pad = jnp.pad(w2, ((0, 0), (0, cls_pad - num_cls)))
    b2_pad = jnp.pad(b2.astype(jnp.float32),
                     (0, cls_pad - num_cls)).reshape(1, cls_pad)
    b1_2d = b1.astype(jnp.float32).reshape(1, hdim)

    # "Everything resident" only works while E/W1/W2 + a batch tile of
    # intermediates fit VMEM.  v7x has 64 MiB physical (32 MiB default scoped)
    # vs 128 MiB on v5e/v6e; at realistic MOGONET sizes (hvcdn_dim = C**V with
    # larger C) W1 alone can exceed this, and a K-reduction grid axis over
    # feat_dim with an f32 accumulator scratch becomes necessary.
    itemsize = lambda a: a.size * a.dtype.itemsize
    resident_bytes = (
        itemsize(e_mat) + itemsize(w1) + itemsize(w2_pad)
        + itemsize(b1_2d) + itemsize(b2_pad)
        + 2 * block_b * vc * 4                  # double-buffered input tiles
        + 2 * block_b * cls_pad * 4             # double-buffered output tiles
        + block_b * (feat_dim + hdim) * 4)      # f32 intermediates
    if resident_bytes > 24 * 1024 * 1024:
        raise ValueError(
            f"VCDN operands need ~{resident_bytes / 2**20:.1f} MiB of VMEM; "
            "add K-tiling over feat_dim (accumulator scratch with pl.when "
            "init/finalize) before scaling num_cls**num_view / hvcdn_dim "
            "this far (binding constraint on v7x's 64 MiB VMEM).")

    out = pl.pallas_call(
        _vcdn_kernel,
        out_shape=jax.ShapeDtypeStruct((batch_pad, cls_pad), jnp.float32),
        grid=grid,
        in_specs=[
            pl.BlockSpec((block_b, vc), lambda i: (i, 0)),     # batch-tiled
            pl.BlockSpec((vc, feat_dim), lambda i: (0, 0)),    # VMEM-resident
            pl.BlockSpec((feat_dim, hdim), lambda i: (0, 0)),  # VMEM-resident
            pl.BlockSpec((1, hdim), lambda i: (0, 0)),         # VMEM-resident
            pl.BlockSpec((hdim, cls_pad), lambda i: (0, 0)),   # VMEM-resident
            pl.BlockSpec((1, cls_pad), lambda i: (0, 0)),      # VMEM-resident
        ],
        out_specs=pl.BlockSpec((block_b, cls_pad), lambda i: (i, 0)),
        compiler_params=pltpu.CompilerParams(
            dimension_semantics=("parallel",)),   # both TCs on v7x
    )(x_packed, e_mat, w1, b1_2d, w2_pad, b2_pad)

    return out[:batch, :num_cls]


def init_vcdn_params(key, num_view, num_cls, hvcdn_dim, dtype=jnp.float32):
    """Mirror the module init: kaiming_normal_ on Linear weights (fan_in,
    gain=sqrt(2)), zero biases.  Weights stored transposed (in, out)."""
    feat_dim = num_cls ** num_view
    k1, k2 = jax.random.split(key)
    w1 = (jax.random.normal(k1, (feat_dim, hvcdn_dim), jnp.float32)
          * jnp.sqrt(2.0 / feat_dim)).astype(dtype)
    w2 = (jax.random.normal(k2, (hvcdn_dim, num_cls), jnp.float32)
          * jnp.sqrt(2.0 / hvcdn_dim)).astype(dtype)
    b1 = jnp.zeros((hvcdn_dim,), jnp.float32)
    b2 = jnp.zeros((num_cls,), jnp.float32)
    return w1, b1, w2, b2


if __name__ == "__main__":
    key = jax.random.PRNGKey(0)

    NUM_VIEW = 3       # omics views
    NUM_CLS = 8        # classes -> feature dim = 8**3 = 512 (lane-dense)
    HVCDN_DIM = 128    # hidden dim (lane-dense)
    BATCH = 256        # 2 batch tiles of 128 rows -> exercises grid + megacore

    k_params, *k_views = jax.random.split(key, 1 + NUM_VIEW)
    in_list = [jax.random.normal(k, (BATCH, NUM_CLS), dtype=jnp.float32)
               for k in k_views]
    w1, b1, w2, b2 = init_vcdn_params(k_params, NUM_VIEW, NUM_CLS, HVCDN_DIM)

    # Pure-JAX reference replicating the PyTorch forward literally.
    sig = [jax.nn.sigmoid(v) for v in in_list]
    x = jnp.matmul(sig[0][:, :, None], sig[1][:, None, :]).reshape(
        BATCH, NUM_CLS ** 2, 1)
    for i in range(2, NUM_VIEW):
        x = jnp.matmul(x, sig[i][:, None, :]).reshape(
            BATCH, NUM_CLS ** (i + 1), 1)
    vcdn_feat = x.reshape(BATCH, NUM_CLS ** NUM_VIEW)
    h_ref = vcdn_feat @ w1 + b1
    h_ref = jnp.where(h_ref >= 0.0, h_ref, 0.25 * h_ref)   # LeakyReLU(0.25)
    ref = h_ref @ w2 + b2

    # f32 weights: parity with the reference.
    out_f32 = vcdn_forward(list(in_list), w1, b1, w2, b2, hi_list=None)
    jax.block_until_ready(out_f32)
    assert out_f32.shape == (BATCH, NUM_CLS)
    assert jnp.allclose(out_f32, ref, atol=2e-4, rtol=2e-4), \
        "f32 kernel mismatch vs reference"

    # bf16-stored weights (perf-review item): same kernel; halves the W1 DMA
    # and uses the native bf16 MXU rate. ~1e-2-level rounding is expected.
    out_bf16 = vcdn_forward(list(in_list),
                            w1.astype(jnp.bfloat16), b1,
                            w2.astype(jnp.bfloat16), b2, hi_list=None)
    jax.block_until_ready(out_bf16)
    assert out_bf16.shape == (BATCH, NUM_CLS)
    assert jnp.allclose(out_bf16, ref, atol=3e-2, rtol=3e-2), \
        "bf16-weight kernel mismatch vs reference"

    print("KERNEL_OK")
</pallas_src>

<mosaic_0001>
module attributes {stable_mosaic.version = 11 : i64} {
  func.func @_vcdn_kernel(%arg0: i32, %arg1: memref<128x24xf32, #tpu.memory_space<vmem>>, %arg2: memref<24x512xf32, #tpu.memory_space<vmem>>, %arg3: memref<512x128xf32, #tpu.memory_space<vmem>>, %arg4: memref<1x128xf32, #tpu.memory_space<vmem>>, %arg5: memref<128x128xf32, #tpu.memory_space<vmem>>, %arg6: memref<1x128xf32, #tpu.memory_space<vmem>>, %arg7: memref<128x128xf32, #tpu.memory_space<vmem>>) attributes {dimension_semantics = [#tpu.dimension_semantics<parallel>], iteration_bounds = array<i64: 2>, scalar_prefetch = 0 : i64, scratch_operands = 0 : i64, tpu.core_type = #tpu.core_type<tc>, window_params = [{transform_indices = @transform_0, window_bounds = array<i64: 128, 24>}, {pipeline_mode = #tpu.pipeline_mode<synchronous>, transform_indices = @transform_1, window_bounds = array<i64: 24, 512>}, {pipeline_mode = #tpu.pipeline_mode<synchronous>, transform_indices = @transform_2, window_bounds = array<i64: 512, 128>}, {pipeline_mode = #tpu.pipeline_mode<synchronous>, transform_indices = @transform_3, window_bounds = array<i64: 1, 128>}, {pipeline_mode = #tpu.pipeline_mode<synchronous>, transform_indices = @transform_4, window_bounds = array<i64: 128, 128>}, {pipeline_mode = #tpu.pipeline_mode<synchronous>, transform_indices = @transform_5, window_bounds = array<i64: 1, 128>}, {transform_indices = @transform_6, window_bounds = array<i64: 128, 128>}]} {
    %c0 = arith.constant 0 : index
    %c0_0 = arith.constant 0 : index
    %0 = vector.load %arg1[%c0, %c0_0] : memref<128x24xf32, #tpu.memory_space<vmem>>, vector<128x24xf32>
    %cst = arith.constant 0.000000e+00 : f32
    %1 = vector.broadcast %cst : f32 to vector<128x24xf32>
    %2 = arith.minimumf %0, %1 : vector<128x24xf32>
    %3 = math.absf %0 : vector<128x24xf32>
    %cst_1 = arith.constant 0.000000e+00 : f32
    %4 = vector.broadcast %cst_1 : f32 to vector<128x24xf32>
    %5 = arith.subf %4, %3 : vector<128x24xf32>
    %6 = math.exp %5 : vector<128x24xf32>
    %cst_2 = arith.constant 1.000000e+00 : f32
    %7 = vector.broadcast %cst_2 : f32 to vector<128x24xf32>
    %8 = arith.addf %7, %6 : vector<128x24xf32>
    %9 = math.log %8 : vector<128x24xf32>
    %10 = arith.subf %2, %9 : vector<128x24xf32>
    %c0_3 = arith.constant 0 : index
    %c0_4 = arith.constant 0 : index
    %11 = vector.load %arg2[%c0_3, %c0_4] : memref<24x512xf32, #tpu.memory_space<vmem>>, vector<24x512xf32>
    %cst_5 = arith.constant dense<0.000000e+00> : vector<128x512xf32>
    %12 = tpu.matmul %10, %11, %cst_5 {dimension_numbers = #tpu.dot_dimension_numbers<[1], [0], [0], [1], [0, 0, 1, 1], [], []>} : vector<128x24xf32>, vector<24x512xf32>, vector<128x512xf32> -> vector<128x512xf32>
    %13 = math.exp %12 : vector<128x512xf32>
    %c0_6 = arith.constant 0 : index
    %c0_7 = arith.constant 0 : index
    %14 = vector.load %arg3[%c0_6, %c0_7] : memref<512x128xf32, #tpu.memory_space<vmem>>, vector<512x128xf32>
    %cst_8 = arith.constant dense<0.000000e+00> : vector<128x128xf32>
    %15 = tpu.matmul %13, %14, %cst_8 {dimension_numbers = #tpu.dot_dimension_numbers<[1], [0], [0], [1], [0, 0, 1, 1], [], []>} : vector<128x512xf32>, vector<512x128xf32>, vector<128x128xf32> -> vector<128x128xf32>
    %c0_9 = arith.constant 0 : index
    %c0_10 = arith.constant 0 : index
    %16 = vector.load %arg4[%c0_9, %c0_10] : memref<1x128xf32, #tpu.memory_space<vmem>>, vector<1x128xf32>
    %17 = vector.broadcast %16 : vector<1x128xf32> to vector<128x128xf32>
    %18 = arith.addf %15, %17 : vector<128x128xf32>
    %cst_11 = arith.constant 0.000000e+00 : f32
    %19 = vector.broadcast %cst_11 : f32 to vector<128x128xf32>
    %20 = arith.cmpf oge, %18, %19 : vector<128x128xf32>
    %cst_12 = arith.constant 2.500000e-01 : f32
    %21 = vector.broadcast %cst_12 : f32 to vector<128x128xf32>
    %22 = arith.mulf %21, %18 : vector<128x128xf32>
    %23 = arith.select %20, %18, %22 : vector<128x128xi1>, vector<128x128xf32>
    %c0_13 = arith.constant 0 : index
    %c0_14 = arith.constant 0 : index
    %24 = vector.load %arg5[%c0_13, %c0_14] : memref<128x128xf32, #tpu.memory_space<vmem>>, vector<128x128xf32>
    %cst_15 = arith.constant dense<0.000000e+00> : vector<128x128xf32>
    %25 = tpu.matmul %23, %24, %cst_15 {dimension_numbers = #tpu.dot_dimension_numbers<[1], [0], [0], [1], [0, 0, 1, 1], [], []>} : vector<128x128xf32>, vector<128x128xf32>, vector<128x128xf32> -> vector<128x128xf32>
    %c0_16 = arith.constant 0 : index
    %c0_17 = arith.constant 0 : index
    %26 = vector.load %arg6[%c0_16, %c0_17] : memref<1x128xf32, #tpu.memory_space<vmem>>, vector<1x128xf32>
    %27 = vector.broadcast %26 : vector<1x128xf32> to vector<128x128xf32>
    %28 = arith.addf %25, %27 : vector<128x128xf32>
    %c0_18 = arith.constant 0 : index
    %c0_19 = arith.constant 0 : index
    %29 = vector.load %arg7[%c0_18, %c0_19] : memref<128x128xf32, #tpu.memory_space<vmem>>, vector<128x128xf32>
    tpu.vector_store %arg7[%c0_18, %c0_19], %28 {strides = array<i32>} : memref<128x128xf32, #tpu.memory_space<vmem>>, vector<128x128xf32>,
    return
  }
  func.func @transform_0(%arg0: i32) -> (i32, i32) {
    %c0_i32 = arith.constant 0 : i32
    %c0_i32_0 = arith.constant 0 : i32
    return %arg0, %c0_i32 : i32, i32
  }
  func.func @transform_1(%arg0: i32) -> (i32, i32) {
    %c0_i32 = arith.constant 0 : i32
    %c0_i32_0 = arith.constant 0 : i32
    %c0_i32_1 = arith.constant 0 : i32
    return %c0_i32, %c0_i32_0 : i32, i32
  }
  func.func @transform_2(%arg0: i32) -> (i32, i32) {
    %c0_i32 = arith.constant 0 : i32
    %c0_i32_0 = arith.constant 0 : i32
    %c0_i32_1 = arith.constant 0 : i32
    return %c0_i32, %c0_i32_0 : i32, i32
  }
  func.func @transform_3(%arg0: i32) -> (i32, i32) {
    %c0_i32 = arith.constant 0 : i32
    %c0_i32_0 = arith.constant 0 : i32
    %c0_i32_1 = arith.constant 0 : i32
    return %c0_i32, %c0_i32_0 : i32, i32
  }
  func.func @transform_4(%arg0: i32) -> (i32, i32) {
    %c0_i32 = arith.constant 0 : i32
    %c0_i32_0 = arith.constant 0 : i32
    %c0_i32_1 = arith.constant 0 : i32
    return %c0_i32, %c0_i32_0 : i32, i32
  }
  func.func @transform_5(%arg0: i32) -> (i32, i32) {
    %c0_i32 = arith.constant 0 : i32
    %c0_i32_0 = arith.constant 0 : i32
    %c0_i32_1 = arith.constant 0 : i32
    return %c0_i32, %c0_i32_0 : i32, i32
  }
  func.func @transform_6(%arg0: i32) -> (i32, i32) {
    %c0_i32 = arith.constant 0 : i32
    %c0_i32_0 = arith.constant 0 : i32
    return %arg0, %c0_i32 : i32, i32
  }
}

</mosaic_0001>

<bundles_post_ra>
// kernel: tpu_custom_call.1
= control target key start
LH: loop header
LB: loop body
LE: loop exit
PB: predicated region body
PF: predicated region fallthrough
CT: control target
= control target key end

     0   :  { %11 = vsyncpa [#allocation3], 0  ;;  %s2411_s0 = inlined_call_operand.vmem [shape: f32[256,24], index: 0, kind: input, shape index: {}]   ;;  %s2412_s1 = inlined_call_operand.vmem [shape: f32[24,512], index: 1, kind: input, shape index: {}]   ;;  %s2413_s2 = inlined_call_operand.hbm [shape: f32[512,128], index: 2, kind: input, shape index: {}]   ;;  %s2414_s3 = inlined_call_operand.vmem [shape: f32[1,128], index: 3, kind: input, shape index: {}]   ;;  %s2415_s4 = inlined_call_operand.vmem [shape: f32[128,128], index: 4, kind: input, shape index: {}]   ;;  %s2416_s5 = inlined_call_operand.vmem [shape: f32[1,128], index: 5, kind: input, shape index: {}]   ;;  %s2417_s6 = inlined_call_operand.hbm [shape: f32[256,128], index: 6, kind: output, shape index: {}]  }
   0x1   :  { %12 = vsyncpa [#allocation4], 0 }
   0x2   :  { %14 = vsyncpa [#allocation4 + $0x1], 0  ;;  %s1920_s21 = smov 0   ;;  %s1922_s22 = smov 0  }
   0x3   :  { %s1924_s23 = smov 0   ;;  %s1926_s24 = smov 0  }
   0x4 LB: > { %s1941_s25 = sadd.s32 4294967295, %s1878_s24   ;;  %s1446_s26 = sadd.s32 4294967294, %s1878_s24   ;;  %s1878_s24 = sphi %s1926_s24, %s2423_s24   ;;  %s1874_s23 = sphi %s1924_s23, %s2422_s23   ;;  %s1870_s22 = sphi %s1922_s22, %s2421_s22   ;;  %s1866_s21 = sphi %s1920_s21, %s2420_s21  }
   0x5   : > { %s1945_s27 = sadd.s32 1, %s1878_s24   ;;  %s158_s28 = sadd.s32 1, %s1874_s23 }
   0x6   : > { %s155_s29 = ssub.s32 %s1878_s24, %s1945_s27  ;;  %p168_p0 = scmp.ne.s32.totalorder %s1874_s23, %s1870_s22 }
   0x7   : > { %p156_p1 = scmp.eq.s32.totalorder %s155_s29, 0  ;;  %p169_p2 = scmp.eq.s32.totalorder %s1941_s25, 1 }
   0x8   : > { %p174_p3 = scmp.ne.s32.totalorder %s1870_s22, %s1866_s21  ;;  %p175_p4 = scmp.eq.s32.totalorder %s1446_s26, 1 }
   0x9   : > { %s1956_s30 = scalar_select %p156_p1, %s1874_s23, %s158_s28  }
   0xa   : > { %p1958_p5 = por %p169_p2, %p168_p0  ;;  %p1962_p6 = por %p175_p4, %p174_p3 }
   0xb   : > { %p1447_p7 = scmp.ge.s32.totalorder %s1878_s24, 1  ;;  %p182_p8 = scmp.lt.s32.totalorder %s1878_s24, 3 }
   0xc   : > { %p1548_p9 = scmp.eq.s32.totalorder %s1941_s25, 0  ;;  %s196_s11 = sshll.u32 %s2413_s2, 4  ;;  %s197_s11 = int_to_ptr.hbm [resolvable:$true] %s196_s11 }
   0xd   : > { %p183_p10 = pnand %p1447_p7, %p182_p8  ;;  %s1880_s12 = smov [#allocation2]  }
   0xe   : > { %s198_s13 = sshll.u32 %s1880_s12, 4  ;;  %s1881_s14 = smov 128   ;;  %s199_s13 = int_to_ptr.vmem [resolvable:$true] %s198_s13 }
   0xf   : > { %p1540_p11 = pneg %p183_p10  ;;  %s1882_s15 = smov 8  }
  0x10   : > { %232 = sbr.rel (%p183_p10) target bundleno = 622 (0x26e), region = 44 }
  0x11   : > { %p1541_p12 = pnand %p1548_p9, %p1540_p11 }
  0x13   : > { %1543 = dma.hbm_to_vmem [thread:$0]  (!%p1541_p12), %s197_s11, 8192, %s199_s13, [#allocation3], %s1881_s14, %s1881_s14, %s1882_s15  }
  0x15   : > { %1857 = dma.done.wait (%p1548_p9), [#allocation3], 8192  }
  0x16   : > { %1859 = vsyncadd (%p1548_p9), [#allocation3], 4294959104  ;;  %s1453_s16 = sshll.u32 %s1941_s25, 4  ;;  %v438_v0 = vld [vmem:[%s2412_s1 + $0x40] sm:$0xff]  ;;  %v440_v9 = vld [vmem:[%s2412_s1 + $0x50] sm:$0xff]  ;;  %vm442_vm0 = vcmask 195584  }
  0x17   : > { %p264_p13 = scmp.lt.s32.totalorder %s1453_s16, 31  ;;  %v434_v1 = vld [vmem:[%s2412_s1 + $0x20] sm:$0xff]  ;;  %504 = vmatpush.msra.mxu0 %v438_v0  ;;  %1525 = vmatpush.msra.mxu1 %v438_v0  ;;  %v441_v14 = vld [vmem:[%s2412_s1 + $0x58] sm:$0xff]  ;;  %v439_v29 = vld [vmem:[%s2412_s1 + $0x48] sm:$0xff]  ;;  %s260_s19 = sand.u32 1, %s1870_s22  }
  0x18   : > { %1526 = vmatpush.msra.mxu2 %v438_v0  ;;  %1527 = vmatpush.msra.mxu3 %v438_v0  ;;  %v430_v5 = vld [vmem:[%s2412_s1] sm:$0xff]  ;;  %v436_v32 = vld [vmem:[%s2412_s1 + $0x30] sm:$0xff]  ;;  %v437_v33 = vld [vmem:[%s2412_s1 + $0x38] sm:$0xff]  ;;  %s1452_s26 = sshll.u32 %s260_s19, 7  ;;  %s1524_s10 = sshll.u32 %s1941_s25, 7 }
  0x19   : > { %s2425_s16 = smov (!%p264_p13, %s1453_s16), 31  ;;  %505 = vmatpush.msra.mxu0 %v434_v1  ;;  %1528 = vmatpush.msra.mxu1 %v434_v1  ;;  %v435_v57 = vld [vmem:[%s2412_s1 + $0x28] sm:$0xff]  ;;  %v432_v58 = vld [vmem:[%s2412_s1 + $0x10] sm:$0xff]  ;;  %s2359_s9 = scalar_lea.vmem [#allocation5], %s1452_s26 }
  0x1a   : > { %s1454_s17 = sshll.u32 %s2425_s16, 3  ;;  %1529 = vmatpush.msra.mxu2 %v434_v1  ;;  %1530 = vmatpush.msra.mxu3 %v434_v1  ;;  %s1368_s13 = scalar_lea.hbm %s2417_s6, %s1524_s10 }
  0x1b   : > { %s1982_s20 = scalar_lea.vmem %s2411_s0, %s1454_s17  ;;  %506 = vmatpush.msra.mxu0 %v430_v5  ;;  %1531 = vmatpush.msra.mxu1 %v430_v5  ;;  %s1371_s14 = sshll.u32 %s1368_s13, 4  ;;  %s1372_s14 = int_to_ptr.hbm [resolvable:$true] %s1371_s14 }
  0x1c   : > { %v1991_v2 = vld [vmem:[%s1982_s20] sm:$0xff]  ;;  %v2016_v15 = vld [vmem:[%s1982_s20 + $0x8] sm:$0xff]  ;;  %1532 = vmatpush.msra.mxu2 %v430_v5  ;;  %1533 = vmatpush.msra.mxu3 %v430_v5  ;;  %v2041_v36 = vld [vmem:[%s1982_s20 + $0x10] sm:$0xff]  ;;  %s1357_s15 = scalar_lea.sflag [#allocation4], %s260_s19  ;;  %s1826_s16 = sshra.s32 %s1372_s14, 4  ;;  %s1827_s16 = int_to_ptr.hbm [resolvable:$true] %s1826_s16 }
  0x1d   : > { %v1994_v3 = vld [vmem:[%s1982_s20 + $0x20] sm:$0xff]  ;;  %v302_v6 = vand.u32 2147483647, %v1991_v2  ;;  %v303_v17 = vand.u32 2147483647, %v2016_v15  ;;  %v2020_v18 = vld [vmem:[%s1982_s20 + $0x28] sm:$0xff]  ;;  %569 = vmatpush.msrb.mxu1 %v439_v29  ;;  %p1833_p3 = scmp.lt.s32.totalorder %s1827_s16, %s2417_s6 }
  0x1e   : > { %v1997_v4 = vld [vmem:[%s1982_s20 + $0x40] sm:$0xff]  ;;  %v306_v7 = vand.u32 2147483647, %v1994_v3  ;;  %v2023_v19 = vld [vmem:[%s1982_s20 + $0x48] sm:$0xff]  ;;  %634 = vmatpush.msrb.mxu2 %v440_v9  ;;  %699 = vmatpush.msrb.mxu3 %v441_v14  ;;  %v307_v25 = vand.u32 2147483647, %v2020_v18 }
  0x1f   : > { %v310_v8 = vand.u32 2147483647, %v1997_v4  ;;  %v2009_v10 = vld [vmem:[%s1982_s20 + $0x60] sm:$0xff]  ;;  %v318_v11 = vsub.f32 0.0, %v302_v6  ;;  %v319_v24 = vsub.f32 0.0, %v303_v17  ;;  %v2028_v28 = vld [vmem:[%s1982_s20 + $0x68] sm:$0xff]  ;;  %570 = vmatpush.msrb.mxu1 %v435_v57 }
  0x20   : > { %v322_v12 = vsub.f32 0.0, %v306_v7  ;;  %v314_v13 = vand.u32 2147483647, %v2009_v10  ;;  %v311_v27 = vand.u32 2147483647, %v2023_v19  ;;  %v323_v31 = vsub.f32 0.0, %v307_v25  ;;  %635 = vmatpush.msrb.mxu2 %v436_v32  ;;  %700 = vmatpush.msrb.mxu3 %v437_v33 }
  0x21   : > { %v326_v16 = vsub.f32 0.0, %v310_v8  ;;  %v334_v20 = vmul.f32 1.442695, %v318_v11  ;;  %v336_v30 = vmul.f32 1.442695, %v319_v24  ;;  %v2044_v37 = vld [vmem:[%s1982_s20 + $0x30] sm:$0xff] }
  0x22   : > { %v342_v21 = vmul.f32 1.442695, %v322_v12  ;;  %v330_v22 = vsub.f32 0.0, %v314_v13  ;;  %v327_v34 = vsub.f32 0.0, %v311_v27  ;;  %v315_v35 = vand.u32 2147483647, %v2028_v28  ;;  %636 = vmatpush.msrb.mxu2 %v432_v58 }
  0x23   : > { %v350_v23 = vmul.f32 1.442695, %v326_v16  ;;  %1590 = vpow2.f32 %v334_v20  ;;  %v344_v38 = vmul.f32 1.442695, %v323_v31  ;;  %v304_v39 = vand.u32 2147483647, %v2041_v36 }
  0x24   : > { %v358_v26 = vmul.f32 1.442695, %v330_v22  ;;  %1592 = vpow2.f32 %v342_v21  ;;  %v2048_v40 = vld [vmem:[%s1982_s20 + $0x50] sm:$0xff]  ;;  %v352_v41 = vmul.f32 1.442695, %v327_v34  ;;  %v331_v42 = vsub.f32 0.0, %v315_v35 }
  0x25   : > { %1594 = vpow2.f32 %v350_v23  ;;  %v308_v43 = vand.u32 2147483647, %v2044_v37  ;;  %v2052_v44 = vld [vmem:[%s1982_s20 + $0x70] sm:$0xff]  ;;  %v312_v47 = vand.u32 2147483647, %v2048_v40  ;;  %v286_v49 = vmin.f32 %v1991_v2, 0.0 }
  0x26   : > { %1596 = vpow2.f32 %v358_v26  ;;  %v360_v46 = vmul.f32 1.442695, %v331_v42  ;;  %v320_v51 = vsub.f32 0.0, %v304_v39  ;;  %v2057_v52 = vld [vmem:[%s1982_s20 + $0x18] sm:$0xff]  ;;  %v290_v54 = vmin.f32 %v1994_v3, 0.0  ;;  %v431_v39 = vld [vmem:[%s2412_s1 + $0x8] sm:$0xff] }
  0x27   : > { %1598 = vpow2.f32 %v336_v30  ;;  %v316_v56 = vand.u32 2147483647, %v2052_v44  ;;  %v294_v60 = vmin.f32 %v1997_v4, 0.0  ;;  %v324_v62 = vsub.f32 0.0, %v308_v43  ;;  %v2069_v63 = vld [vmem:[%s1982_s20 + $0x38] sm:$0xff]  ;;  %571 = vmatpush.msrb.mxu1 %v431_v39  ;;  %s1828_s25 = scalar_lea.hbm %s1827_s16, 128 }
  0x28   : > { %1600 = vpow2.f32 %v344_v38  ;;  %v328_v5 = vsub.f32 0.0, %v312_v47  ;;  %v305_v6 = vand.u32 2147483647, %v2057_v52  ;;  %v2073_v7 = vld [vmem:[%s1982_s20 + $0x58] sm:$0xff]  ;;  %v298_v9 = vmin.f32 %v2009_v10, 0.0  ;;  %p1829_p0 = scmp.ne.s32.totalorder %s1827_s16, %s1828_s25  ;;  %s1832_s26 = scalar_lea.hbm %s2417_s6, 256 }
  0x29   : > { %v1591_v45 = vpop.eup %1590  ;;  %1602 = vpow2.f32 %v352_v41  ;;  %v338_v12 = vmul.f32 1.442695, %v320_v51  ;;  %v332_v16 = vsub.f32 0.0, %v316_v56  ;;  %v309_v17 = vand.u32 2147483647, %v2069_v63  ;;  %v2078_v20 = vld [vmem:[%s1982_s20 + $0x78] sm:$0xff]  ;;  %p1834_p4 = scmp.lt.s32.totalorder %s1832_s26, %s1828_s25 }
  0x2a   : > { %v1593_v48 = vpop.eup %1592  ;;  %v366_v50 = vadd.f32 1.0, %v1591_v45  ;;  %1604 = vpow2.f32 %v360_v46  ;;  %v321_v22 = vsub.f32 0.0, %v305_v6  ;;  %v313_v23 = vand.u32 2147483647, %v2073_v7  ;;  %v433_v31 = vld [vmem:[%s2412_s1 + $0x18] sm:$0xff]  ;;  %s1369_s20 = sshll.u32 %s2359_s9, 4  ;;  %p1830_p1 = pnand %p1829_p0, %p1958_p5  ;;  %s1370_s20 = int_to_ptr.vmem [resolvable:$true] %s1369_s20 }
  0x2b   : > { %v1595_v53 = vpop.eup %1594  ;;  %v370_v55 = vadd.f32 1.0, %v1593_v48  ;;  %v346_v25 = vmul.f32 1.442695, %v324_v62  ;;  %v354_v26 = vmul.f32 1.442695, %v328_v5  ;;  %v325_v10 = vsub.f32 0.0, %v309_v17  ;;  %701 = vmatpush.msrb.mxu3 %v433_v31  ;;  %p1835_p7 = por %p1834_p4, %p1833_p3 }
  0x2c   : > { %v1597_v59 = vpop.eup %1596  ;;  %1606 = vlog2.f32 %v366_v50  ;;  %v374_v61 = vadd.f32 1.0, %v1595_v53  ;;  %v329_v30 = vsub.f32 0.0, %v313_v23  ;;  %v317_v32 = vand.u32 2147483647, %v2078_v20  ;;  %v926_v31 = vld [vmem:[#allocation2 + $0x178] sm:$0xff]  ;;  %p1831_p2 = pneg %p1830_p1 }
  0x2d   : > { %v1599_v0 = vpop.eup %1598  ;;  %1608 = vlog2.f32 %v370_v55  ;;  %v378_v1 = vadd.f32 1.0, %v1597_v59  ;;  %v287_v35 = vmin.f32 %v2016_v15, 0.0  ;;  %v362_v38 = vmul.f32 1.442695, %v332_v16 }
  0x2e   : > { %v1601_v8 = vpop.eup %1600  ;;  %1610 = vlog2.f32 %v374_v61  ;;  %v367_v11 = vadd.f32 1.0, %v1599_v0  ;;  %v340_v43 = vmul.f32 1.442695, %v321_v22  ;;  %v333_v45 = vsub.f32 0.0, %v317_v32  ;;  %v942_v32 = vld [vmem:[#allocation2 + $0x1f8] sm:$0xff]  ;;  %p1836_p8 = pnand %p1835_p7, %p1831_p2 }
  0x2f   : > { %v1603_v13 = vpop.eup %1602  ;;  %1612 = vlog2.f32 %v378_v1  ;;  %v371_v14 = vadd.f32 1.0, %v1601_v8  ;;  %v348_v15 = vmul.f32 1.442695, %v325_v10  ;;  %v356_v55 = vmul.f32 1.442695, %v329_v30 }
  0x30   : > { %1614 = vlog2.f32 %v367_v11  ;;  %v375_v21 = vadd.f32 1.0, %v1603_v13  ;;  %v1605_v24 = vpop.eup %1604  ;;  %v364_v57 = vmul.f32 1.442695, %v333_v45  ;;  %v295_v4 = vmin.f32 %v2023_v19, 0.0 }
  0x31   : > { %1616 = vlog2.f32 %v371_v14  ;;  %v379_v29 = vadd.f32 1.0, %v1605_v24  ;;  %v299_v0 = vmin.f32 %v2028_v28, 0.0  ;;  %v292_v30 = vmin.f32 %v2044_v37, 0.0 }
  0x32   : > { %v1607_v27 = vpop.eup %1606  ;;  %1618 = vlog2.f32 %v375_v21  ;;  %v300_v39 = vmin.f32 %v2052_v44, 0.0 }
  0x33   : > { %v1609_v33 = vpop.eup %1608  ;;  %v383_v34 = vmul.f32 0.6931472, %v1607_v27  ;;  %1620 = vpow2.f32 %v338_v12 }
  0x34   : > { %v1611_v41 = vpop.eup %1610  ;;  %v391_v42 = vmul.f32 0.6931472, %v1609_v33  ;;  %1622 = vlog2.f32 %v379_v29 }
  0x35   : > { %v1613_v46 = vpop.eup %1612  ;;  %v2091_v47 = vsub.f32 %v286_v49, %v383_v34  ;;  %v399_v48 = vmul.f32 0.6931472, %v1611_v41  ;;  %1624 = vpow2.f32 %v346_v25  ;;  %v288_v25 = vmin.f32 %v2041_v36, 0.0 }
  0x36   : > { %v1615_v50 = vpop.eup %1614  ;;  %v2095_v51 = vsub.f32 %v290_v54, %v391_v42  ;;  %v407_v53 = vmul.f32 0.6931472, %v1613_v46  ;;  %1626 = vpow2.f32 %v354_v26  ;;  %v291_v54 = vmin.f32 %v2020_v18, 0.0 }
  0x37   : > { %v1617_v56 = vpop.eup %1616  ;;  %1455 = vmatmul.msk.f32.vlgmr.msra.gmra.mxu0 %vm442_vm0, %v2091_v47  ;;  %v2101_v2 = vsub.f32 %v294_v60, %v399_v48  ;;  %v385_v49 = vmul.f32 0.6931472, %v1615_v50  ;;  %1628 = vpow2.f32 %v362_v38  ;;  %v296_v34 = vmin.f32 %v2048_v40, 0.0 }
  0x38   : > { %v1619_v58 = vpop.eup %1618  ;;  %1459 = vmatmul.msk.f32.vlgmr.msra.gmra.mxu1 %vm442_vm0, %v2095_v51  ;;  %v2105_v3 = vsub.f32 %v298_v9, %v407_v53  ;;  %v393_v59 = vmul.f32 0.6931472, %v1617_v56  ;;  %1630 = vpow2.f32 %v340_v43  ;;  %v289_v40 = vmin.f32 %v2057_v52, 0.0 }
  0x39   : > { %v1621_v61 = vpop.eup %1620  ;;  %1463 = vmatmul.msk.f32.vlgmr.msra.gmra.mxu2 %vm442_vm0, %v2101_v2  ;;  %v401_v60 = vmul.f32 0.6931472, %v1619_v58  ;;  %1632 = vpow2.f32 %v348_v15  ;;  %v2114_v18 = vsub.f32 %v287_v35, %v385_v49  ;;  %v293_v53 = vmin.f32 %v2069_v63, 0.0 }
  0x3a   : > { %v1623_v62 = vpop.eup %1622  ;;  %1467 = vmatmul.msk.f32.vlgmr.msra.gmra.mxu3 %vm442_vm0, %v2105_v3  ;;  %v368_v1 = vadd.f32 1.0, %v1621_v61  ;;  %1634 = vpow2.f32 %v356_v55  ;;  %v2116_v9 = vsub.f32 %v291_v54, %v393_v59  ;;  %1077 = vmatpush.msra.mxu2 %v926_v31  ;;  %v297_v49 = vmin.f32 %v2073_v7, 0.0  ;;  %v925_v61 = vld [vmem:[#allocation2 + $0x170] sm:$0xff] }
  0x3b   : > { %v1625_v5 = vpop.eup %1624  ;;  %v409_v6 = vmul.f32 0.6931472, %v1623_v62  ;;  %1636 = vpow2.f32 %v364_v57  ;;  %v2118_v12 = vsub.f32 %v295_v4, %v401_v60  ;;  %1142 = vmatpush.msra.mxu3 %v942_v32  ;;  %v910_v57 = vld [vmem:[#allocation2 + $0xf8] sm:$0xff]  ;;  %v301_v54 = vmin.f32 %v2078_v20, 0.0  ;;  %v941_v4 = vld [vmem:[#allocation2 + $0x1f0] sm:$0xff]  ;;  %v924_v62 = vld [vmem:[#allocation2 + $0x168] sm:$0xff] }
  0x3c   : > { %v1627_v8 = vpop.eup %1626  ;;  %1638 = vlog2.f32 %v368_v1  ;;  %v372_v19 = vadd.f32 1.0, %v1625_v5  ;;  %1012 = vmatpush.msra.mxu1 %v910_v57  ;;  %1078 = vmatpush.msra.mxu2 %v925_v61  ;;  %v909_v20 = vld [vmem:[#allocation2 + $0xf0] sm:$0xff]  ;;  %v908_v1 = vld [vmem:[#allocation2 + $0xe8] sm:$0xff]  ;;  %v923_v5 = vld [vmem:[#allocation2 + $0x160] sm:$0xff] }
  0x3d   : > { %v1629_v11 = vpop.eup %1628  ;;  %v376_v13 = vadd.f32 1.0, %v1627_v8  ;;  %v2120_v16 = vsub.f32 %v299_v0, %v409_v6  ;;  %1143 = vmatpush.msra.mxu3 %v941_v4  ;;  %v940_v0 = vld [vmem:[#allocation2 + $0x1e8] sm:$0xff]  ;;  %v939_v6 = vld [vmem:[#allocation2 + $0x1e0] sm:$0xff]  ;;  %v889_v31 = vld [vmem:[#allocation2 + $0x50] sm:$0xff] }
  0x3e   : > { %v1631_v14 = vpop.eup %1630  ;;  %1640 = vlog2.f32 %v372_v19  ;;  %v380_v28 = vadd.f32 1.0, %v1629_v11  ;;  %1013 = vmatpush.msra.mxu1 %v909_v20  ;;  %1079 = vmatpush.msra.mxu2 %v924_v62  ;;  %v907_v8 = vld [vmem:[#allocation2 + $0xe0] sm:$0xff]  ;;  %v922_v19 = vld [vmem:[#allocation2 + $0x158] sm:$0xff]  ;;  %v888_v32 = vld [vmem:[#allocation2 + $0x48] sm:$0xff] }
  0x3f   : > { %v1633_v17 = vpop.eup %1632  ;;  %1456 = vmatmul.msk.f32.gmra.mxu0 %vm442_vm0, %v2114_v18  ;;  %1642 = vlog2.f32 %v376_v13  ;;  %v369_v21 = vadd.f32 1.0, %v1631_v14  ;;  %1144 = vmatpush.msra.mxu3 %v940_v0  ;;  %v938_v11 = vld [vmem:[#allocation2 + $0x1d8] sm:$0xff]  ;;  %v921_v13 = vld [vmem:[#allocation2 + $0x150] sm:$0xff]  ;;  %v912_v61 = vld [vmem:[#allocation2 + $0x108] sm:$0xff] }
  0x40   : > { %v1635_v22 = vpop.eup %1634  ;;  %1460 = vmatmul.msk.f32.gmra.mxu1 %vm442_vm0, %v2116_v9  ;;  %1644 = vlog2.f32 %v380_v28  ;;  %v373_v23 = vadd.f32 1.0, %v1633_v17  ;;  %1080 = vmatpush.msra.mxu2 %v923_v5  ;;  %v937_v14 = vld [vmem:[#allocation2 + $0x1d0] sm:$0xff]  ;;  %v920_v28 = vld [vmem:[#allocation2 + $0x148] sm:$0xff] }
  0x41   : > { %v1637_v24 = vpop.eup %1636  ;;  %1464 = vmatmul.msk.f32.gmra.mxu2 %vm442_vm0, %v2118_v12  ;;  %1646 = vlog2.f32 %v369_v21  ;;  %v377_v26 = vadd.f32 1.0, %v1635_v22  ;;  %1014 = vmatpush.msra.mxu1 %v908_v1  ;;  %v936_v17 = vld [vmem:[#allocation2 + $0x1c8] sm:$0xff]  ;;  %v919_v22 = vld [vmem:[#allocation2 + $0x140] sm:$0xff]  ;;  %v929_v57 = vld [vmem:[#allocation2 + $0x190] sm:$0xff] }
  0x42   : > { %v1639_v10 = vpop.eup %1638  ;;  %1468 = vmatmul.msk.f32.gmra.mxu3 %vm442_vm0, %v2120_v16  ;;  %1648 = vlog2.f32 %v373_v23  ;;  %v381_v27 = vadd.f32 1.0, %v1637_v24  ;;  %1081 = vmatpush.msra.mxu2 %v922_v19  ;;  %v904_v21 = vld [vmem:[#allocation2 + $0xc8] sm:$0xff]  ;;  %v935_v23 = vld [vmem:[#allocation2 + $0x1c0] sm:$0xff]  ;;  %v894_v24 = vld [vmem:[#allocation2 + $0x78] sm:$0xff] }
  0x43   : > { %v387_v29 = vmul.f32 0.6931472, %v1639_v10  ;;  %1650 = vlog2.f32 %v377_v26  ;;  %1145 = vmatpush.msra.mxu3 %v939_v6  ;;  %1015 = vmatpush.msra.mxu1 %v907_v8  ;;  %v893_v26 = vld [vmem:[#allocation2 + $0x70] sm:$0xff]  ;;  %v918_v10 = vld [vmem:[#allocation2 + $0x138] sm:$0xff]  ;;  %v928_v4 = vld [vmem:[#allocation2 + $0x188] sm:$0xff] }
  0x44   : > { %v1641_v33 = vpop.eup %1640  ;;  %1652 = vlog2.f32 %v381_v27  ;;  %1082 = vmatpush.msra.mxu2 %v921_v13  ;;  %947 = vmatpush.msrb.mxu0 %v894_v24  ;;  %v934_v27 = vld [vmem:[#allocation2 + $0x1b8] sm:$0xff]  ;;  %v895_v6 = vld [vmem:[#allocation2 + $0x80] sm:$0xff] }
  0x45   : > { %v1643_v36 = vpop.eup %1642  ;;  %v2133_v35 = vsub.f32 %v288_v25, %v387_v29  ;;  %v395_v38 = vmul.f32 0.6931472, %v1641_v33  ;;  %1146 = vmatpush.msra.mxu3 %v938_v11  ;;  %v903_v25 = vld [vmem:[#allocation2 + $0xc0] sm:$0xff]  ;;  %v917_v33 = vld [vmem:[#allocation2 + $0x130] sm:$0xff] }
  0x46   : > { %v1645_v41 = vpop.eup %1644  ;;  %v403_v42 = vmul.f32 0.6931472, %v1643_v36  ;;  %1083 = vmatpush.msra.mxu2 %v920_v28  ;;  %948 = vmatpush.msrb.mxu0 %v893_v26  ;;  %v891_v29 = vld [vmem:[#allocation2 + $0x60] sm:$0xff] }
  0x47   : > { %v1647_v43 = vpop.eup %1646  ;;  %1457 = vmatmul.msk.f32.gmra.mxu0 %vm442_vm0, %v2133_v35  ;;  %v2138_v37 = vsub.f32 %v292_v30, %v395_v38  ;;  %v411_v45 = vmul.f32 0.6931472, %v1645_v41  ;;  %1147 = vmatpush.msra.mxu3 %v937_v14  ;;  %v890_v30 = vld [vmem:[#allocation2 + $0x58] sm:$0xff]  ;;  %v887_v36 = vld [vmem:[#allocation2 + $0x40] sm:$0xff]  ;;  %v901_v38 = vld [vmem:[#allocation2 + $0xb0] sm:$0xff] }
  0x48   : > { %v1649_v46 = vpop.eup %1648  ;;  %v2141_v48 = vsub.f32 %v296_v34, %v403_v42  ;;  %v389_v15 = vmul.f32 0.6931472, %v1647_v43  ;;  %1084 = vmatpush.msra.mxu2 %v919_v22  ;;  %v933_v34 = vld [vmem:[#allocation2 + $0x1b0] sm:$0xff]  ;;  %v884_v41 = vld [vmem:[#allocation2 + $0x28] sm:$0xff]  ;;  %v883_v42 = vld [vmem:[#allocation2 + $0x20] sm:$0xff] }
  0x49   : > { %v1651_v50 = vpop.eup %1650  ;;  %1461 = vmatmul.msk.f32.gmra.mxu1 %vm442_vm0, %v2138_v37  ;;  %v2145_v44 = vsub.f32 %v300_v39, %v411_v45  ;;  %v397_v55 = vmul.f32 0.6931472, %v1649_v46  ;;  %1148 = vmatpush.msra.mxu3 %v936_v17  ;;  %v885_v39 = vld [vmem:[#allocation2 + $0x30] sm:$0xff]  ;;  %v916_v43 = vld [vmem:[#allocation2 + $0x128] sm:$0xff]  ;;  %v882_v45 = vld [vmem:[#allocation2 + $0x18] sm:$0xff] }
  0x4a   : > { %v1653_v56 = vpop.eup %1652  ;;  %1465 = vmatmul.msk.f32.gmra.mxu2 %vm442_vm0, %v2141_v48  ;;  %v405_v52 = vmul.f32 0.6931472, %v1651_v50  ;;  %v417_v58 = vsub.f32 %v289_v40, %v389_v15  ;;  %v900_v40 = vld [vmem:[#allocation2 + $0xa8] sm:$0xff]  ;;  %v881_v46 = vld [vmem:[#allocation2 + $0x10] sm:$0xff]  ;;  %v879_v50 = vld [vmem:[#allocation2] sm:$0xff] }
  0x4b   : > { %1469 = vmatmul.msk.f32.gmra.mxu3 %vm442_vm0, %v2145_v44  ;;  %v413_v59 = vmul.f32 0.6931472, %v1653_v56  ;;  %v2154_v63 = vsub.f32 %v293_v53, %v397_v55  ;;  %1085 = vmatpush.msra.mxu2 %v918_v10  ;;  %v880_v15 = vld [vmem:[#allocation2 + $0x8] sm:$0xff]  ;;  %v915_v53 = vld [vmem:[#allocation2 + $0x120] sm:$0xff] }
  0x4c   : > { %v2156_v60 = vsub.f32 %v297_v49, %v405_v52  ;;  %1149 = vmatpush.msra.mxu3 %v935_v23  ;;  %v931_v55 = vld [vmem:[#allocation2 + $0x1a0] sm:$0xff]  ;;  %v930_v49 = vld [vmem:[#allocation2 + $0x198] sm:$0xff] }
  0x4d   : > { %v2159_v7 = vsub.f32 %v301_v54, %v413_v59  ;;  %1086 = vmatpush.msra.mxu2 %v917_v33  ;;  %v899_v56 = vld [vmem:[#allocation2 + $0xa0] sm:$0xff]  ;;  %v898_v52 = vld [vmem:[#allocation2 + $0x98] sm:$0xff] }
  0x4e   : > { %1150 = vmatpush.msra.mxu3 %v934_v27  ;;  %v927_v8 = vld [vmem:[#allocation2 + $0x180] sm:$0xff] }
  0x4f   : > { %1458 = vmatmul.msk.f32.gmra.mxu0 %vm442_vm0, %v417_v58  ;;  %1087 = vmatpush.msra.mxu2 %v916_v43 }
  0x50   : > { %1151 = vmatpush.msra.mxu3 %v933_v34 }
  0x51   : > { %1462 = vmatmul.msk.f32.gmra.mxu1 %vm442_vm0, %v2154_v63  ;;  %1088 = vmatpush.msra.mxu2 %v915_v53 }
  0x52   : > { %1466 = vmatmul.msk.f32.gmra.mxu2 %vm442_vm0, %v2156_v60 }
  0x53   : > { %1470 = vmatmul.msk.f32.gmra.mxu3 %vm442_vm0, %v2159_v7 }
  0x59   : > { %1471 = vmatmul.msk.f32.vlgmr.msrb.gmra.mxu1 %vm442_vm0, %v2091_v47 }
  0x5a   : > { %1487 = vmatmul.msk.f32.vlgmr.msrb.gmra.mxu2 %vm442_vm0, %v2091_v47 }
  0x5b   : > { %1503 = vmatmul.msk.f32.vlgmr.msrb.gmra.mxu3 %vm442_vm0, %v2091_v47  ;;  %v906_v47 = vld [vmem:[#allocation2 + $0xd8] sm:$0xff] }
  0x5c   : > { %1016 = vmatpush.msra.mxu1 %v906_v47 }
  0x61   : > { %1472 = vmatmul.msk.f32.gmra.mxu1 %vm442_vm0, %v2114_v18 }
  0x62   : > { %1488 = vmatmul.msk.f32.gmra.mxu2 %vm442_vm0, %v2114_v18 }
  0x63   : > { %1504 = vmatmul.msk.f32.gmra.mxu3 %vm442_vm0, %v2114_v18  ;;  %v905_v18 = vld [vmem:[#allocation2 + $0xd0] sm:$0xff] }
  0x64   : > { %1017 = vmatpush.msra.mxu1 %v905_v18 }
  0x66   : > { %1018 = vmatpush.msra.mxu1 %v904_v21 }
  0x68   : > { %1019 = vmatpush.msra.mxu1 %v903_v25 }
  0x69   : > { %1473 = vmatmul.msk.f32.gmra.mxu1 %vm442_vm0, %v2133_v35 }
  0x6a   : > { %1489 = vmatmul.msk.f32.gmra.mxu2 %vm442_vm0, %v2133_v35 }
  0x6b   : > { %1505 = vmatmul.msk.f32.gmra.mxu3 %vm442_vm0, %v2133_v35  ;;  %v886_v35 = vld [vmem:[#allocation2 + $0x38] sm:$0xff] }
  0x71   : > { %1474 = vmatmul.msk.f32.gmra.mxu1 %vm442_vm0, %v417_v58 }
  0x72   : > { %1490 = vmatmul.msk.f32.gmra.mxu2 %vm442_vm0, %v417_v58 }
  0x73   : > { %1506 = vmatmul.msk.f32.gmra.mxu3 %vm442_vm0, %v417_v58  ;;  %v897_v58 = vld [vmem:[#allocation2 + $0x90] sm:$0xff] }
  0x79   : > { %1475 = vmatmul.msk.f32.gmra.mxu1 %vm442_vm0, %v2095_v51 }
  0x7a   : > { %1491 = vmatmul.msk.f32.gmra.mxu2 %vm442_vm0, %v2095_v51 }
  0x7b   : > { %1507 = vmatmul.msk.f32.gmra.mxu3 %vm442_vm0, %v2095_v51  ;;  %v892_v51 = vld [vmem:[#allocation2 + $0x68] sm:$0xff] }
  0x7c   : > { %949 = vmatpush.msrb.mxu0 %v892_v51 }
  0x7e   : > { %950 = vmatpush.msrb.mxu0 %v891_v29  ;;  %v1269_v29 = vld [vmem:[%s2415_s4 + $0x70] sm:$0xff] }
  0x80   : > { %951 = vmatpush.msrb.mxu0 %v890_v30 }
  0x81   : > { %1476 = vmatmul.msk.f32.gmra.mxu1 %vm442_vm0, %v2116_v9 }
  0x82   : > { %1492 = vmatmul.msk.f32.gmra.mxu2 %vm442_vm0, %v2116_v9  ;;  %952 = vmatpush.msrb.mxu0 %v889_v31 }
  0x83   : > { %1508 = vmatmul.msk.f32.gmra.mxu3 %vm442_vm0, %v2116_v9  ;;  %v902_v9 = vld [vmem:[#allocation2 + $0xb8] sm:$0xff] }
  0x84   : > { %1020 = vmatpush.msra.mxu1 %v902_v9  ;;  %953 = vmatpush.msrb.mxu0 %v888_v32 }
  0x86   : > { %954 = vmatpush.msrb.mxu0 %v887_v36  ;;  %1021 = vmatpush.msra.mxu1 %v901_v38  ;;  %v1268_v38 = vld [vmem:[%s2415_s4 + $0x68] sm:$0xff] }
  0x88   : > { %955 = vmatpush.msrb.mxu0 %v886_v35  ;;  %1022 = vmatpush.msra.mxu1 %v900_v40 }
  0x89   : > { %1477 = vmatmul.msk.f32.gmra.mxu1 %vm442_vm0, %v2138_v37 }
  0x8a   : > { %1493 = vmatmul.msk.f32.gmra.mxu2 %vm442_vm0, %v2138_v37  ;;  %956 = vmatpush.msrb.mxu0 %v885_v39 }
  0x8b   : > { %1509 = vmatmul.msk.f32.gmra.mxu3 %vm442_vm0, %v2138_v37  ;;  %v932_v37 = vld [vmem:[#allocation2 + $0x1a8] sm:$0xff]  ;;  %1023 = vmatpush.msra.mxu1 %v899_v56 }
  0x8c   : > { %957 = vmatpush.msrb.mxu0 %v884_v41  ;;  %1152 = vmatpush.msra.mxu3 %v932_v37 }
  0x8d   : > { %1024 = vmatpush.msra.mxu1 %v898_v52 }
  0x8e   : > { %958 = vmatpush.msrb.mxu0 %v883_v42  ;;  %1153 = vmatpush.msra.mxu3 %v931_v55  ;;  %v1267_v55 = vld [vmem:[%s2415_s4 + $0x60] sm:$0xff] }
  0x8f   : > { %1025 = vmatpush.msra.mxu1 %v897_v58 }
  0x90   : > { %959 = vmatpush.msrb.mxu0 %v882_v45  ;;  %1154 = vmatpush.msra.mxu3 %v930_v49 }
  0x91   : > { %1478 = vmatmul.msk.f32.gmra.mxu1 %vm442_vm0, %v2154_v63 }
  0x92   : > { %1494 = vmatmul.msk.f32.gmra.mxu2 %vm442_vm0, %v2154_v63  ;;  %960 = vmatpush.msrb.mxu0 %v881_v46 }
  0x93   : > { %1510 = vmatmul.msk.f32.gmra.mxu3 %vm442_vm0, %v2154_v63  ;;  %v896_v63 = vld [vmem:[#allocation2 + $0x88] sm:$0xff] }
  0x94   : > { %961 = vmatpush.msrb.mxu0 %v880_v15  ;;  %1155 = vmatpush.msra.mxu3 %v929_v57 }
  0x95   : > { %1026 = vmatpush.msra.mxu1 %v896_v63 }
  0x96   : > { %962 = vmatpush.msrb.mxu0 %v879_v50  ;;  %1156 = vmatpush.msra.mxu3 %v928_v4  ;;  %v1266_v4 = vld [vmem:[%s2415_s4 + $0x58] sm:$0xff] }
  0x97   : > { %1027 = vmatpush.msra.mxu1 %v895_v6 }
  0x98   : > { %1157 = vmatpush.msra.mxu3 %v927_v8 }
  0x99   : > { %1479 = vmatmul.msk.f32.gmra.mxu1 %vm442_vm0, %v2101_v2 }
  0x9a   : > { %1495 = vmatmul.msk.f32.gmra.mxu2 %vm442_vm0, %v2101_v2 }
  0x9b   : > { %1511 = vmatmul.msk.f32.gmra.mxu3 %vm442_vm0, %v2101_v2  ;;  %v914_v2 = vld [vmem:[#allocation2 + $0x118] sm:$0xff] }
  0x9c   : > { %1089 = vmatpush.msra.mxu2 %v914_v2 }
  0xa1   : > { %1480 = vmatmul.msk.f32.gmra.mxu1 %vm442_vm0, %v2118_v12 }
  0xa2   : > { %1496 = vmatmul.msk.f32.gmra.mxu2 %vm442_vm0, %v2118_v12 }
  0xa3   : > { %1512 = vmatmul.msk.f32.gmra.mxu3 %vm442_vm0, %v2118_v12  ;;  %v913_v12 = vld [vmem:[#allocation2 + $0x110] sm:$0xff] }
  0xa4   : > { %1090 = vmatpush.msra.mxu2 %v913_v12 }
  0xa6   : > { %1091 = vmatpush.msra.mxu2 %v912_v61 }
  0xa9   : > { %1481 = vmatmul.msk.f32.gmra.mxu1 %vm442_vm0, %v2141_v48 }
  0xaa   : > { %1497 = vmatmul.msk.f32.gmra.mxu2 %vm442_vm0, %v2141_v48 }
  0xab   : > { %1513 = vmatmul.msk.f32.gmra.mxu3 %vm442_vm0, %v2141_v48 }
  0xb1   : > { %1482 = vmatmul.msk.f32.gmra.mxu1 %vm442_vm0, %v2156_v60 }
  0xb2   : > { %1498 = vmatmul.msk.f32.gmra.mxu2 %vm442_vm0, %v2156_v60 }
  0xb3   : > { %1514 = vmatmul.msk.f32.gmra.mxu3 %vm442_vm0, %v2156_v60 }
  0xb4   : > { %v508_v54 = vpop.f32.mrf.mxu0 }
  0xb5   : > { %v751_v48 = vmul.f32 1.442695, %v508_v54  ;;  %v520_v59 = vpop.f32.mrf.mxu1 }
  0xb6   : > { %v783_v24 = vmul.f32 1.442695, %v520_v59 }
  0xb7   : > { %1654 = vpow2.f32 %v751_v48 }
  0xb9   : > { %1483 = vmatmul.msk.f32.gmra.mxu1 %vm442_vm0, %v2105_v3 }
  0xba   : > { %1499 = vmatmul.msk.f32.gmra.mxu2 %vm442_vm0, %v2105_v3 }
  0xbb   : > { %1515 = vmatmul.msk.f32.gmra.mxu3 %vm442_vm0, %v2105_v3  ;;  %v911_v3 = vld [vmem:[#allocation2 + $0x100] sm:$0xff] }
  0xbc   : > { %v2242_v60 = vpop.f32.mrf.mxu2  ;;  %v511_v20 = vpop.f32.mrf.mxu0  ;;  %1092 = vmatpush.msra.mxu2 %v911_v3 }
  0xbd   : > { %v1655_v62 = vpop.eup %1654  ;;  %v759_v0 = vmul.f32 1.442695, %v511_v20  ;;  %v523_v1 = vpop.f32.mrf.mxu1  ;;  %v815_v63 = vmul.f32 1.442695, %v2242_v60  ;;  %v1265_v60 = vld [vmem:[%s2415_s4 + $0x50] sm:$0xff] }
  0xbe   : > { %v2244_v5 = vpop.f32.mrf.mxu3  ;;  %963 = vmatmul.f32.vlgmr.msrb.gmra.mxu0 %v1655_v62  ;;  %v791_v30 = vmul.f32 1.442695, %v523_v1 }
  0xbf   : > { %1656 = vpow2.f32 %v759_v0 }
  0xc1   : > { %1484 = vmatmul.msk.f32.gmra.mxu1 %vm442_vm0, %v2120_v16 }
  0xc2   : > { %1500 = vmatmul.msk.f32.gmra.mxu2 %vm442_vm0, %v2120_v16 }
  0xc3   : > { %1516 = vmatmul.msk.f32.gmra.mxu3 %vm442_vm0, %v2120_v16 }
  0xc4   : > { %v2252_v19 = vpop.f32.mrf.mxu2  ;;  %v514_v11 = vpop.f32.mrf.mxu0 }
  0xc5   : > { %v767_v47 = vmul.f32 1.442695, %v514_v11  ;;  %v1657_v14 = vpop.eup %1656 }
  0xc6   : > { %v2254_v13 = vpop.f32.mrf.mxu3  ;;  %v526_v18 = vpop.f32.mrf.mxu1  ;;  %966 = vmatmul.f32.gmra.mxu0 %v1657_v14 }
  0xc7   : > { %1658 = vpow2.f32 %v767_v47  ;;  %v799_v39 = vmul.f32 1.442695, %v526_v18  ;;  %v823_v18 = vmul.f32 1.442695, %v2252_v19  ;;  %v1264_v19 = vld [vmem:[%s2415_s4 + $0x48] sm:$0xff] }
  0xc9   : > { %1485 = vmatmul.msk.f32.gmra.mxu1 %vm442_vm0, %v2145_v44 }
  0xca   : > { %1501 = vmatmul.msk.f32.gmra.mxu2 %vm442_vm0, %v2145_v44 }
  0xcb   : > { %1517 = vmatmul.msk.f32.gmra.mxu3 %vm442_vm0, %v2145_v44  ;;  %v1270_v44 = vld [vmem:[%s2415_s4 + $0x78] sm:$0xff] }
  0xcc   : > { %v517_v16 = vpop.f32.mrf.mxu0  ;;  %1275 = vmatpush.msra.mxu0 %v1270_v44 }
  0xcd   : > { %v2262_v28 = vpop.f32.mrf.mxu2  ;;  %v775_v17 = vmul.f32 1.442695, %v517_v16  ;;  %v1659_v21 = vpop.eup %1658 }
  0xce   : > { %v529_v22 = vpop.f32.mrf.mxu1  ;;  %v2264_v23 = vpop.f32.mrf.mxu3  ;;  %969 = vmatmul.f32.gmra.mxu0 %v1659_v21 }
  0xcf   : > { %1660 = vpow2.f32 %v775_v17  ;;  %1276 = vmatpush.msra.mxu0 %v1269_v29  ;;  %v807_v56 = vmul.f32 1.442695, %v529_v22 }
  0xd0   : > { %1662 = vpow2.f32 %v783_v24 }
  0xd1   : > { %1486 = vmatmul.msk.f32.gmra.mxu1 %vm442_vm0, %v2159_v7  ;;  %1277 = vmatpush.msra.mxu0 %v1268_v38 }
  0xd2   : > { %1502 = vmatmul.msk.f32.gmra.mxu2 %vm442_vm0, %v2159_v7 }
  0xd3   : > { %1518 = vmatmul.msk.f32.gmra.mxu3 %vm442_vm0, %v2159_v7  ;;  %1278 = vmatpush.msra.mxu0 %v1267_v55 }
  0xd5   : > { %v1661_v25 = vpop.eup %1660  ;;  %v2275_v26 = vpop.f32.mrf.mxu2  ;;  %1279 = vmatpush.msra.mxu0 %v1266_v4  ;;  %v855_v4 = vmul.f32 1.442695, %v2254_v13  ;;  %v1260_v13 = vld [vmem:[%s2415_s4 + $0x28] sm:$0xff] }
  0xd6   : > { %v2277_v51 = vpop.f32.mrf.mxu3  ;;  %v573_v10 = vpop.f32.mrf.mxu1  ;;  %972 = vmatmul.f32.gmra.mxu0 %v1661_v25 }
  0xd7   : > { %v753_v27 = vmul.f32 1.442695, %v573_v10  ;;  %v1663_v7 = vpop.eup %1662  ;;  %1280 = vmatpush.msra.mxu0 %v1265_v60 }
  0xd9   : > { %1664 = vpow2.f32 %v753_v27  ;;  %1281 = vmatpush.msra.mxu0 %v1264_v19 }
  0xda   : > { %1666 = vpow2.f32 %v791_v30  ;;  %v831_v30 = vmul.f32 1.442695, %v2262_v28  ;;  %v1263_v28 = vld [vmem:[%s2415_s4 + $0x40] sm:$0xff] }
  0xdb   : > { %1282 = vmatpush.msra.mxu0 %v1263_v28 }
  0xdd   : > { %v638_v9 = vpop.f32.mrf.mxu2 }
  0xde   : > { %v755_v31 = vmul.f32 1.442695, %v638_v9  ;;  %v576_v32 = vpop.f32.mrf.mxu1  ;;  %v703_v33 = vpop.f32.mrf.mxu3  ;;  %975 = vmatmul.f32.gmra.mxu0 %v1663_v7 }
  0xdf   : > { %v761_v34 = vmul.f32 1.442695, %v576_v32  ;;  %v757_v36 = vmul.f32 1.442695, %v703_v33  ;;  %v1665_v35 = vpop.eup %1664 }
  0xe0   : > { %1668 = vpow2.f32 %v755_v31  ;;  %1028 = vmatmul.f32.vlgmr.msra.gmra.mxu1 %v1665_v35  ;;  %v1667_v41 = vpop.eup %1666 }
  0xe1   : > { %1670 = vpow2.f32 %v761_v34 }
  0xe2   : > { %1672 = vpow2.f32 %v757_v36 }
  0xe3   : > { %1674 = vpow2.f32 %v799_v39 }
  0xe5   : > { %v641_v42 = vpop.f32.mrf.mxu2 }
  0xe6   : > { %v1669_v43 = vpop.eup %1668  ;;  %v763_v37 = vmul.f32 1.442695, %v641_v42  ;;  %v579_v45 = vpop.f32.mrf.mxu1  ;;  %978 = vmatmul.f32.gmra.mxu0 %v1667_v41  ;;  %v839_v41 = vmul.f32 1.442695, %v2275_v26  ;;  %v1262_v26 = vld [vmem:[%s2415_s4 + $0x38] sm:$0xff] }
  0xe7   : > { %v706_v40 = vpop.f32.mrf.mxu3  ;;  %v1671_v46 = vpop.eup %1670  ;;  %v769_v15 = vmul.f32 1.442695, %v579_v45  ;;  %1093 = vmatmul.f32.vlgmr.msra.gmra.mxu2 %v1669_v43  ;;  %1283 = vmatpush.msra.mxu0 %v1262_v26 }
  0xe8   : > { %v765_v50 = vmul.f32 1.442695, %v706_v40  ;;  %v1673_v53 = vpop.eup %1672  ;;  %1676 = vpow2.f32 %v763_v37  ;;  %1031 = vmatmul.f32.gmra.mxu1 %v1671_v46 }
  0xe9   : > { %1678 = vpow2.f32 %v769_v15  ;;  %1158 = vmatmul.f32.vlgmr.msra.gmra.mxu3 %v1673_v53  ;;  %v1675_v2 = vpop.eup %1674 }
  0xea   : > { %1680 = vpow2.f32 %v765_v50 }
  0xeb   : > { %1682 = vpow2.f32 %v807_v56  ;;  %v847_v56 = vmul.f32 1.442695, %v2244_v5  ;;  %v1261_v5 = vld [vmem:[%s2415_s4 + $0x30] sm:$0xff] }
  0xec   : > { %1284 = vmatpush.msra.mxu0 %v1261_v5 }
  0xed   : > { %v644_v49 = vpop.f32.mrf.mxu2 }
  0xee   : > { %v1677_v52 = vpop.eup %1676  ;;  %v771_v12 = vmul.f32 1.442695, %v644_v49  ;;  %v582_v57 = vpop.f32.mrf.mxu1  ;;  %981 = vmatmul.f32.gmra.mxu0 %v1675_v2 }
  0xef   : > { %v709_v58 = vpop.f32.mrf.mxu3  ;;  %v1679_v54 = vpop.eup %1678  ;;  %v777_v48 = vmul.f32 1.442695, %v582_v57  ;;  %1096 = vmatmul.f32.gmra.mxu2 %v1677_v52  ;;  %1285 = vmatpush.msra.mxu0 %v1260_v13 }
  0xf0   : > { %v773_v59 = vmul.f32 1.442695, %v709_v58  ;;  %v1681_v61 = vpop.eup %1680  ;;  %1684 = vpow2.f32 %v771_v12  ;;  %1034 = vmatmul.f32.gmra.mxu1 %v1679_v54 }
  0xf1   : > { %1686 = vpow2.f32 %v777_v48  ;;  %1161 = vmatmul.f32.gmra.mxu3 %v1681_v61  ;;  %v1683_v20 = vpop.eup %1682 }
  0xf2   : > { %1688 = vpow2.f32 %v773_v59 }
  0xf3   : > { %1690 = vpow2.f32 %v815_v63 }
  0xf5   : > { %v647_v62 = vpop.f32.mrf.mxu2 }
  0xf6   : > { %v1685_v0 = vpop.eup %1684  ;;  %v779_v1 = vmul.f32 1.442695, %v647_v62  ;;  %v585_v6 = vpop.f32.mrf.mxu1  ;;  %984 = vmatmul.f32.gmra.mxu0 %v1683_v20 }
  0xf7   : > { %v712_v3 = vpop.f32.mrf.mxu3  ;;  %v1687_v8 = vpop.eup %1686  ;;  %v785_v11 = vmul.f32 1.442695, %v585_v6  ;;  %1099 = vmatmul.f32.gmra.mxu2 %v1685_v0 }
  0xf8   : > { %v781_v47 = vmul.f32 1.442695, %v712_v3  ;;  %v1689_v14 = vpop.eup %1688  ;;  %1692 = vpow2.f32 %v779_v1  ;;  %1037 = vmatmul.f32.gmra.mxu1 %v1687_v8 }
  0xf9   : > { %1694 = vpow2.f32 %v785_v11  ;;  %1164 = vmatmul.f32.gmra.mxu3 %v1689_v14  ;;  %v1691_v16 = vpop.eup %1690  ;;  %v863_v14 = vmul.f32 1.442695, %v2264_v23  ;;  %v1259_v23 = vld [vmem:[%s2415_s4 + $0x20] sm:$0xff] }
  0xfa   : > { %1696 = vpow2.f32 %v781_v47  ;;  %1286 = vmatpush.msra.mxu0 %v1259_v23 }
  0xfb   : > { %1698 = vpow2.f32 %v823_v18 }
  0xfd   : > { %v650_v17 = vpop.f32.mrf.mxu2 }
  0xfe   : > { %v1693_v21 = vpop.eup %1692  ;;  %v787_v22 = vmul.f32 1.442695, %v650_v17  ;;  %v588_v44 = vpop.f32.mrf.mxu1  ;;  %987 = vmatmul.f32.gmra.mxu0 %v1691_v16 }
  0xff   : > { %v715_v24 = vpop.f32.mrf.mxu3  ;;  %v1695_v25 = vpop.eup %1694  ;;  %v793_v10 = vmul.f32 1.442695, %v588_v44  ;;  %1102 = vmatmul.f32.gmra.mxu2 %v1693_v21 }
 0x100   : > { %v789_v27 = vmul.f32 1.442695, %v715_v24  ;;  %v1697_v29 = vpop.eup %1696  ;;  %1700 = vpow2.f32 %v787_v22  ;;  %1040 = vmatmul.f32.gmra.mxu1 %v1695_v25 }
 0x101   : > { %1702 = vpow2.f32 %v793_v10  ;;  %1167 = vmatmul.f32.gmra.mxu3 %v1697_v29  ;;  %v1699_v9 = vpop.eup %1698 }
 0x102   : > { %1704 = vpow2.f32 %v789_v27  ;;  %v871_v27 = vmul.f32 1.442695, %v2277_v51  ;;  %v1258_v51 = vld [vmem:[%s2415_s4 + $0x18] sm:$0xff] }
 0x103   : > { %1706 = vpow2.f32 %v831_v30  ;;  %1287 = vmatpush.msra.mxu0 %v1258_v51 }
 0x105   : > { %v653_v7 = vpop.f32.mrf.mxu2 }
 0x106   : > { %v1701_v31 = vpop.eup %1700  ;;  %v795_v32 = vmul.f32 1.442695, %v653_v7  ;;  %v591_v33 = vpop.f32.mrf.mxu1  ;;  %990 = vmatmul.f32.gmra.mxu0 %v1699_v9 }
 0x107   : > { %v718_v34 = vpop.f32.mrf.mxu3  ;;  %v1703_v36 = vpop.eup %1702  ;;  %v801_v35 = vmul.f32 1.442695, %v591_v33  ;;  %1105 = vmatmul.f32.gmra.mxu2 %v1701_v31 }
 0x108   : > { %v797_v38 = vmul.f32 1.442695, %v718_v34  ;;  %v1705_v39 = vpop.eup %1704  ;;  %1708 = vpow2.f32 %v795_v32  ;;  %1043 = vmatmul.f32.gmra.mxu1 %v1703_v36 }
 0x109   : > { %1710 = vpow2.f32 %v801_v35  ;;  %1170 = vmatmul.f32.gmra.mxu3 %v1705_v39  ;;  %v1707_v42 = vpop.eup %1706 }
 0x10a   : > { %1712 = vpow2.f32 %v797_v38 }
 0x10b   : > { %1714 = vpow2.f32 %v839_v41 }
 0x10d   : > { %v656_v43 = vpop.f32.mrf.mxu2 }
 0x10e   : > { %v1709_v37 = vpop.eup %1708  ;;  %v803_v45 = vmul.f32 1.442695, %v656_v43  ;;  %v594_v40 = vpop.f32.mrf.mxu1  ;;  %993 = vmatmul.f32.gmra.mxu0 %v1707_v42 }
 0x10f   : > { %v721_v46 = vpop.f32.mrf.mxu3  ;;  %v1711_v15 = vpop.eup %1710  ;;  %v809_v50 = vmul.f32 1.442695, %v594_v40  ;;  %1108 = vmatmul.f32.gmra.mxu2 %v1709_v37 }
 0x110   : > { %v805_v53 = vmul.f32 1.442695, %v721_v46  ;;  %v1713_v55 = vpop.eup %1712  ;;  %1716 = vpow2.f32 %v803_v45  ;;  %1046 = vmatmul.f32.gmra.mxu1 %v1711_v15  ;;  %v1257_v46 = vld [vmem:[%s2415_s4 + $0x10] sm:$0xff] }
 0x111   : > { %1718 = vpow2.f32 %v809_v50  ;;  %1173 = vmatmul.f32.gmra.mxu3 %v1713_v55  ;;  %v1715_v2 = vpop.eup %1714  ;;  %1288 = vmatpush.msra.mxu0 %v1257_v46 }
 0x112   : > { %1720 = vpow2.f32 %v805_v53 }
 0x113   : > { %1722 = vpow2.f32 %v847_v56 }
 0x115   : > { %v659_v49 = vpop.f32.mrf.mxu2 }
 0x116   : > { %v1717_v52 = vpop.eup %1716  ;;  %v811_v12 = vmul.f32 1.442695, %v659_v49  ;;  %v597_v57 = vpop.f32.mrf.mxu1  ;;  %996 = vmatmul.f32.gmra.mxu0 %v1715_v2 }
 0x117   : > { %v724_v58 = vpop.f32.mrf.mxu3  ;;  %v1719_v54 = vpop.eup %1718  ;;  %v817_v48 = vmul.f32 1.442695, %v597_v57  ;;  %1111 = vmatmul.f32.gmra.mxu2 %v1717_v52 }
 0x118   : > { %v813_v59 = vmul.f32 1.442695, %v724_v58  ;;  %v1721_v61 = vpop.eup %1720  ;;  %1724 = vpow2.f32 %v811_v12  ;;  %1049 = vmatmul.f32.gmra.mxu1 %v1719_v54  ;;  %v1256_v12 = vld [vmem:[%s2415_s4 + $0x8] sm:$0xff] }
 0x119   : > { %1726 = vpow2.f32 %v817_v48  ;;  %1176 = vmatmul.f32.gmra.mxu3 %v1721_v61  ;;  %v1723_v63 = vpop.eup %1722  ;;  %1289 = vmatpush.msra.mxu0 %v1256_v12 }
 0x11a   : > { %1728 = vpow2.f32 %v813_v59 }
 0x11b   : > { %1730 = vpow2.f32 %v855_v4 }
 0x11d   : > { %v662_v20 = vpop.f32.mrf.mxu2 }
 0x11e   : > { %v1725_v62 = vpop.eup %1724  ;;  %v819_v0 = vmul.f32 1.442695, %v662_v20  ;;  %v600_v1 = vpop.f32.mrf.mxu1  ;;  %999 = vmatmul.f32.gmra.mxu0 %v1723_v63 }
 0x11f   : > { %v727_v6 = vpop.f32.mrf.mxu3  ;;  %v1727_v3 = vpop.eup %1726  ;;  %v825_v8 = vmul.f32 1.442695, %v600_v1  ;;  %1114 = vmatmul.f32.gmra.mxu2 %v1725_v62  ;;  %v1255_v62 = vld [vmem:[%s2415_s4] sm:$0xff] }
 0x120   : > { %v821_v11 = vmul.f32 1.442695, %v727_v6  ;;  %v1729_v47 = vpop.eup %1728  ;;  %1732 = vpow2.f32 %v819_v0  ;;  %1052 = vmatmul.f32.gmra.mxu1 %v1727_v3  ;;  %1290 = vmatpush.msra.mxu0 %v1255_v62 }
 0x121   : > { %1734 = vpow2.f32 %v825_v8  ;;  %1179 = vmatmul.f32.gmra.mxu3 %v1729_v47  ;;  %v1731_v60 = vpop.eup %1730 }
 0x122   : > { %1736 = vpow2.f32 %v821_v11 }
 0x123   : > { %1738 = vpow2.f32 %v863_v14 }
 0x125   : > { %v665_v18 = vpop.f32.mrf.mxu2 }
 0x126   : > { %v1733_v16 = vpop.eup %1732  ;;  %v827_v17 = vmul.f32 1.442695, %v665_v18  ;;  %v603_v21 = vpop.f32.mrf.mxu1  ;;  %1002 = vmatmul.f32.gmra.mxu0 %v1731_v60 }
 0x127   : > { %v730_v22 = vpop.f32.mrf.mxu3  ;;  %v1735_v44 = vpop.eup %1734  ;;  %v833_v24 = vmul.f32 1.442695, %v603_v21  ;;  %1117 = vmatmul.f32.gmra.mxu2 %v1733_v16 }
 0x128   : > { %v829_v25 = vmul.f32 1.442695, %v730_v22  ;;  %v1737_v10 = vpop.eup %1736  ;;  %1740 = vpow2.f32 %v827_v17  ;;  %1055 = vmatmul.f32.gmra.mxu1 %v1735_v44 }
 0x129   : > { %1742 = vpow2.f32 %v833_v24  ;;  %1182 = vmatmul.f32.gmra.mxu3 %v1737_v10  ;;  %v1739_v29 = vpop.eup %1738 }
 0x12a   : > { %1744 = vpow2.f32 %v829_v25 }
 0x12b   : > { %1746 = vpow2.f32 %v871_v27 }
 0x12d   : > { %v668_v19 = vpop.f32.mrf.mxu2 }
 0x12e   : > { %v1741_v30 = vpop.eup %1740  ;;  %v835_v9 = vmul.f32 1.442695, %v668_v19  ;;  %v606_v7 = vpop.f32.mrf.mxu1  ;;  %1005 = vmatmul.f32.gmra.mxu0 %v1739_v29  ;;  %v2335_v29 = vld [vmem:[%s2414_s3] ss:$0 sm:$0xff] }
 0x12f   : > { %v733_v31 = vpop.f32.mrf.mxu3  ;;  %v1743_v32 = vpop.eup %1742  ;;  %v841_v33 = vmul.f32 1.442695, %v606_v7  ;;  %1120 = vmatmul.f32.gmra.mxu2 %v1741_v30 }
 0x130   : > { %v837_v34 = vmul.f32 1.442695, %v733_v31  ;;  %v1745_v36 = vpop.eup %1744  ;;  %1748 = vpow2.f32 %v835_v9  ;;  %1058 = vmatmul.f32.gmra.mxu1 %v1743_v32 }
 0x131   : > { %1750 = vpow2.f32 %v841_v33  ;;  %1185 = vmatmul.f32.gmra.mxu3 %v1745_v36  ;;  %v1747_v35 = vpop.eup %1746 }
 0x132   : > { %1752 = vpow2.f32 %v837_v34 }
 0x135   : > { %v671_v38 = vpop.f32.mrf.mxu2 }
 0x136   : > { %v1749_v39 = vpop.eup %1748  ;;  %v843_v28 = vmul.f32 1.442695, %v671_v38  ;;  %v609_v41 = vpop.f32.mrf.mxu1  ;;  %1008 = vmatmul.f32.gmra.mxu0 %v1747_v35 }
 0x137   : > { %v736_v42 = vpop.f32.mrf.mxu3  ;;  %v1751_v43 = vpop.eup %1750  ;;  %v849_v37 = vmul.f32 1.442695, %v609_v41  ;;  %1123 = vmatmul.f32.gmra.mxu2 %v1749_v39 }
 0x138   : > { %v845_v45 = vmul.f32 1.442695, %v736_v42  ;;  %v1753_v40 = vpop.eup %1752  ;;  %1754 = vpow2.f32 %v843_v28  ;;  %1061 = vmatmul.f32.gmra.mxu1 %v1751_v43 }
 0x139   : > { %1756 = vpow2.f32 %v849_v37  ;;  %1188 = vmatmul.f32.gmra.mxu3 %v1753_v40 }
 0x13a   : > { %1758 = vpow2.f32 %v845_v45 }
 0x13b   : > { %v964_v57 = vpop.f32.mrf.mxu0 }
 0x13c   : > { %v965_v19 = vadd.f32 %v2335_v29, %v964_v57 }
 0x13d   : > { %v674_v15 = vpop.f32.mrf.mxu2 }
 0x13e   : > { %v1755_v50 = vpop.eup %1754  ;;  %v851_v53 = vmul.f32 1.442695, %v674_v15  ;;  %v612_v55 = vpop.f32.mrf.mxu1 }
 0x13f   : > { %v739_v26 = vpop.f32.mrf.mxu3  ;;  %v1757_v56 = vpop.eup %1756  ;;  %v857_v2 = vmul.f32 1.442695, %v612_v55  ;;  %1126 = vmatmul.f32.gmra.mxu2 %v1755_v50 }
 0x140   : > { %v853_v49 = vmul.f32 1.442695, %v739_v26  ;;  %v1759_v52 = vpop.eup %1758  ;;  %1760 = vpow2.f32 %v851_v53  ;;  %1064 = vmatmul.f32.gmra.mxu1 %v1757_v56 }
 0x141   : > { %1762 = vpow2.f32 %v857_v2  ;;  %1191 = vmatmul.f32.gmra.mxu3 %v1759_v52 }
 0x142   : > { %1764 = vpow2.f32 %v853_v49 }
 0x143   : > { %v967_v60 = vpop.f32.mrf.mxu0 }
 0x144   : > { %v968_v32 = vadd.f32 %v2335_v29, %v967_v60 }
 0x145   : > { %v677_v58 = vpop.f32.mrf.mxu2 }
 0x146   : > { %v1761_v54 = vpop.eup %1760  ;;  %v859_v48 = vmul.f32 1.442695, %v677_v58  ;;  %v615_v59 = vpop.f32.mrf.mxu1 }
 0x147   : > { %v742_v61 = vpop.f32.mrf.mxu3  ;;  %v1763_v5 = vpop.eup %1762  ;;  %v865_v4 = vmul.f32 1.442695, %v615_v59  ;;  %1129 = vmatmul.f32.gmra.mxu2 %v1761_v54 }
 0x148   : > { %v861_v63 = vmul.f32 1.442695, %v742_v61  ;;  %v1765_v20 = vpop.eup %1764  ;;  %1766 = vpow2.f32 %v859_v48  ;;  %1067 = vmatmul.f32.gmra.mxu1 %v1763_v5 }
 0x149   : > { %1768 = vpow2.f32 %v865_v4  ;;  %1194 = vmatmul.f32.gmra.mxu3 %v1765_v20 }
 0x14a   : > { %1770 = vpow2.f32 %v861_v63 }
 0x14b   : > { %v970_v25 = vpop.f32.mrf.mxu0 }
 0x14c   : > { %v971_v42 = vadd.f32 %v2335_v29, %v970_v25 }
 0x14d   : > { %v680_v0 = vpop.f32.mrf.mxu2 }
 0x14e   : > { %v1767_v1 = vpop.eup %1766  ;;  %v867_v6 = vmul.f32 1.442695, %v680_v0  ;;  %v618_v3 = vpop.f32.mrf.mxu1 }
 0x14f   : > { %v745_v8 = vpop.f32.mrf.mxu3  ;;  %v1769_v11 = vpop.eup %1768  ;;  %v873_v47 = vmul.f32 1.442695, %v618_v3  ;;  %1132 = vmatmul.f32.gmra.mxu2 %v1767_v1 }
 0x150   : > { %v869_v13 = vmul.f32 1.442695, %v745_v8  ;;  %v1771_v14 = vpop.eup %1770  ;;  %1772 = vpow2.f32 %v867_v6  ;;  %1070 = vmatmul.f32.gmra.mxu1 %v1769_v11 }
 0x151   : > { %1774 = vpow2.f32 %v873_v47  ;;  %1197 = vmatmul.f32.gmra.mxu3 %v1771_v14 }
 0x152   : > { %1776 = vpow2.f32 %v869_v13 }
 0x153   : > { %v973_v30 = vpop.f32.mrf.mxu0 }
 0x154   : > { %v974_v26 = vadd.f32 %v2335_v29, %v973_v30 }
 0x155   : > { %v683_v18 = vpop.f32.mrf.mxu2 }
 0x156   : > { %v1773_v16 = vpop.eup %1772  ;;  %v875_v17 = vmul.f32 1.442695, %v683_v18 }
 0x157   : > { %v748_v21 = vpop.f32.mrf.mxu3  ;;  %v1775_v22 = vpop.eup %1774  ;;  %1135 = vmatmul.f32.gmra.mxu2 %v1773_v16 }
 0x158   : > { %v877_v44 = vmul.f32 1.442695, %v748_v21  ;;  %v1777_v24 = vpop.eup %1776  ;;  %1778 = vpow2.f32 %v875_v17  ;;  %1073 = vmatmul.f32.gmra.mxu1 %v1775_v22 }
 0x159   : > { %1200 = vmatmul.f32.gmra.mxu3 %v1777_v24 }
 0x15a   : > { %1780 = vpow2.f32 %v877_v44 }
 0x15b   : > { %v976_v51 = vpop.f32.mrf.mxu0 }
 0x15c   : > { %v977_v63 = vadd.f32 %v2335_v29, %v976_v51 }
 0x15d   : > { %v1029_v23 = vpop.f32.mrf.mxu1 }
 0x15e   : > { %v1779_v10 = vpop.eup %1778  ;;  %v1030_v7 = vadd.f32 %v1029_v23, %v965_v19 }
 0x15f   : > { %1138 = vmatmul.f32.gmra.mxu2 %v1779_v10 }
 0x160   : > { %v1781_v27 = vpop.eup %1780 }
 0x161   : > { %1203 = vmatmul.f32.gmra.mxu3 %v1781_v27 }
 0x163   : > { %v979_v50 = vpop.f32.mrf.mxu0 }
 0x164   : > { %v980_v13 = vadd.f32 %v2335_v29, %v979_v50 }
 0x165   : > { %v1032_v9 = vpop.f32.mrf.mxu1 }
 0x166   : > { %v1033_v38 = vadd.f32 %v1032_v9, %v968_v32 }
 0x16a   : > { %v1094_v31 = vpop.f32.mrf.mxu2 }
 0x16b   : > { %v1095_v33 = vadd.f32 %v1094_v31, %v1030_v7  ;;  %v982_v54 = vpop.f32.mrf.mxu0 }
 0x16c   : > { %v1159_v34 = vpop.f32.mrf.mxu3  ;;  %v983_v25 = vadd.f32 %v2335_v29, %v982_v54 }
 0x16d   : > { %v1160_v36 = vadd.f32 %v1159_v34, %v1095_v33  ;;  %v1035_v35 = vpop.f32.mrf.mxu1 }
 0x16e   : > { %v1036_v46 = vadd.f32 %v1035_v35, %v971_v42 }
 0x16f   : > { %vm1207_vm1 = vcmp.ge.f32.partialorder %v1160_v36, 0.0  ;;  %v1223_v39 = vmul.f32 0.25, %v1160_v36 }
 0x171   : > { %v1239_v28 = vsel %vm1207_vm1, %v1160_v36, %v1223_v39 }
 0x172   : > { %v1097_v41 = vpop.f32.mrf.mxu2  ;;  %1291 = vmatmul.f32.vlgmr.msra.gmra.mxu0 %v1239_v28 }
 0x173   : > { %v1098_v43 = vadd.f32 %v1097_v41, %v1033_v38  ;;  %v985_v3 = vpop.f32.mrf.mxu0 }
 0x174   : > { %v1162_v37 = vpop.f32.mrf.mxu3  ;;  %v986_v32 = vadd.f32 %v2335_v29, %v985_v3 }
 0x175   : > { %v1163_v45 = vadd.f32 %v1162_v37, %v1098_v43  ;;  %v1038_v40 = vpop.f32.mrf.mxu1 }
 0x176   : > { %v1039_v12 = vadd.f32 %v1038_v40, %v974_v26 }
 0x177   : > { %vm1208_vm2 = vcmp.ge.f32.partialorder %v1163_v45, 0.0  ;;  %v1224_v15 = vmul.f32 0.25, %v1163_v45 }
 0x179   : > { %v1240_v53 = vsel %vm1208_vm2, %v1163_v45, %v1224_v15 }
 0x17a   : > { %v1100_v55 = vpop.f32.mrf.mxu2  ;;  %1294 = vmatmul.f32.gmra.mxu0 %v1240_v53 }
 0x17b   : > { %v1101_v56 = vadd.f32 %v1100_v55, %v1036_v46  ;;  %v988_v44 = vpop.f32.mrf.mxu0 }
 0x17c   : > { %v1165_v2 = vpop.f32.mrf.mxu3  ;;  %v989_v42 = vadd.f32 %v2335_v29, %v988_v44 }
 0x17d   : > { %v1166_v49 = vadd.f32 %v1165_v2, %v1101_v56  ;;  %v1041_v52 = vpop.f32.mrf.mxu1 }
 0x17e   : > { %v1042_v62 = vadd.f32 %v1041_v52, %v977_v63 }
 0x17f   : > { %vm1209_vm3 = vcmp.ge.f32.partialorder %v1166_v49, 0.0  ;;  %v1225_v57 = vmul.f32 0.25, %v1166_v49 }
 0x181   : > { %v1241_v58 = vsel %vm1209_vm3, %v1166_v49, %v1225_v57 }
 0x182   : > { %v1103_v48 = vpop.f32.mrf.mxu2  ;;  %1297 = vmatmul.f32.gmra.mxu0 %v1241_v58 }
 0x183   : > { %v1104_v59 = vadd.f32 %v1103_v48, %v1039_v12  ;;  %v991_v34 = vpop.f32.mrf.mxu0 }
 0x184   : > { %v1168_v61 = vpop.f32.mrf.mxu3  ;;  %v992_v26 = vadd.f32 %v2335_v29, %v991_v34 }
 0x185   : > { %v1169_v5 = vadd.f32 %v1168_v61, %v1104_v59  ;;  %v1044_v4 = vpop.f32.mrf.mxu1 }
 0x186   : > { %v1045_v60 = vadd.f32 %v1044_v4, %v980_v13 }
 0x187   : > { %vm1210_vm4 = vcmp.ge.f32.partialorder %v1169_v5, 0.0  ;;  %v1226_v20 = vmul.f32 0.25, %v1169_v5 }
 0x189   : > { %v1242_v0 = vsel %vm1210_vm4, %v1169_v5, %v1226_v20 }
 0x18a   : > { %v1106_v1 = vpop.f32.mrf.mxu2  ;;  %1300 = vmatmul.f32.gmra.mxu0 %v1242_v0 }
 0x18b   : > { %v1107_v6 = vadd.f32 %v1106_v1, %v1042_v62  ;;  %v994_v40 = vpop.f32.mrf.mxu0 }
 0x18c   : > { %v1171_v8 = vpop.f32.mrf.mxu3  ;;  %v995_v59 = vadd.f32 %v2335_v29, %v994_v40 }
 0x18d   : > { %v1172_v11 = vadd.f32 %v1171_v8, %v1107_v6  ;;  %v1047_v47 = vpop.f32.mrf.mxu1 }
 0x18e   : > { %v1048_v23 = vadd.f32 %v1047_v47, %v983_v25 }
 0x18f   : > { %v1227_v14 = vmul.f32 0.25, %v1172_v11  ;;  %vm1211_vm5 = vcmp.ge.f32.partialorder %v1172_v11, 0.0 }
 0x191   : > { %v1243_v18 = vsel %vm1211_vm5, %v1172_v11, %v1227_v14 }
 0x192   : > { %v1109_v16 = vpop.f32.mrf.mxu2  ;;  %1303 = vmatmul.f32.gmra.mxu0 %v1243_v18 }
 0x193   : > { %v1110_v17 = vadd.f32 %v1109_v16, %v1045_v60  ;;  %v997_v57 = vpop.f32.mrf.mxu0 }
 0x194   : > { %v1174_v21 = vpop.f32.mrf.mxu3  ;;  %v998_v6 = vadd.f32 %v2335_v29, %v997_v57 }
 0x195   : > { %v1175_v22 = vadd.f32 %v1174_v21, %v1110_v17  ;;  %v1050_v24 = vpop.f32.mrf.mxu1 }
 0x196   : > { %v1051_v36 = vadd.f32 %v1050_v24, %v986_v32 }
 0x197   : > { %v1228_v10 = vmul.f32 0.25, %v1175_v22  ;;  %vm1212_vm6 = vcmp.ge.f32.partialorder %v1175_v22, 0.0 }
 0x199   : > { %v1244_v27 = vsel %vm1212_vm6, %v1175_v22, %v1228_v10 }
 0x19a   : > { %v1112_v19 = vpop.f32.mrf.mxu2  ;;  %1306 = vmatmul.f32.gmra.mxu0 %v1244_v27 }
 0x19b   : > { %v1113_v30 = vadd.f32 %v1112_v19, %v1048_v23  ;;  %v1000_v1 = vpop.f32.mrf.mxu0 }
 0x19c   : > { %v1177_v9 = vpop.f32.mrf.mxu3  ;;  %v1001_v16 = vadd.f32 %v2335_v29, %v1000_v1 }
 0x19d   : > { %v1178_v7 = vadd.f32 %v1177_v9, %v1113_v30  ;;  %v1053_v31 = vpop.f32.mrf.mxu1 }
 0x19e   : > { %v1054_v37 = vadd.f32 %v1053_v31, %v989_v42 }
 0x19f   : > { %v1229_v33 = vmul.f32 0.25, %v1178_v7  ;;  %vm1213_vm7 = vcmp.ge.f32.partialorder %v1178_v7, 0.0 }
 0x1a1   : > { %v1245_v51 = vsel %vm1213_vm7, %v1178_v7, %v1229_v33 }
 0x1a2   : > { %v1115_v35 = vpop.f32.mrf.mxu2  ;;  %1309 = vmatmul.f32.gmra.mxu0 %v1245_v51 }
 0x1a3   : > { %v1116_v38 = vadd.f32 %v1115_v35, %v1051_v36  ;;  %v1003_v21 = vpop.f32.mrf.mxu0 }
 0x1a4   : > { %v1180_v39 = vpop.f32.mrf.mxu3  ;;  %v1004_v19 = vadd.f32 %v2335_v29, %v1003_v21 }
 0x1a5   : > { %v1181_v28 = vadd.f32 %v1180_v39, %v1116_v38  ;;  %v1056_v41 = vpop.f32.mrf.mxu1 }
 0x1a6   : > { %v1057_v2 = vadd.f32 %v1056_v41, %v992_v26 }
 0x1a7   : > { %v1230_v43 = vmul.f32 0.25, %v1181_v28  ;;  %vm1214_vm8 = vcmp.ge.f32.partialorder %v1181_v28, 0.0 }
 0x1a9   : > { %v1246_v45 = vsel %vm1214_vm8, %v1181_v28, %v1230_v43 }
 0x1aa   : > { %v1118_v46 = vpop.f32.mrf.mxu2  ;;  %1312 = vmatmul.f32.gmra.mxu0 %v1246_v45 }
 0x1ab   : > { %v1119_v15 = vadd.f32 %v1118_v46, %v1054_v37  ;;  %v1006_v31 = vpop.f32.mrf.mxu0 }
 0x1ac   : > { %v1183_v50 = vpop.f32.mrf.mxu3  ;;  %v1007_v35 = vadd.f32 %v2335_v29, %v1006_v31 }
 0x1ad   : > { %v1184_v53 = vadd.f32 %v1183_v50, %v1119_v15  ;;  %v1059_v55 = vpop.f32.mrf.mxu1 }
 0x1ae   : > { %v1060_v5 = vadd.f32 %v1059_v55, %v995_v59 }
 0x1af   : > { %v1231_v56 = vmul.f32 0.25, %v1184_v53  ;;  %vm1215_vm9 = vcmp.ge.f32.partialorder %v1184_v53, 0.0 }
 0x1b1   : > { %v1247_v49 = vsel %vm1215_vm9, %v1184_v53, %v1231_v56 }
 0x1b2   : > { %v1121_v52 = vpop.f32.mrf.mxu2  ;;  %1315 = vmatmul.f32.gmra.mxu0 %v1247_v49 }
 0x1b3   : > { %v1122_v12 = vadd.f32 %v1121_v52, %v1057_v2  ;;  %v1009_v43 = vpop.f32.mrf.mxu0 }
 0x1b4   : > { %v1186_v58 = vpop.f32.mrf.mxu3  ;;  %v1010_v46 = vadd.f32 %v2335_v29, %v1009_v43  ;;  %v1589_v29 = vld [vmem:[%s2416_s5] ss:$0 sm:$0xff] }
 0x1b5   : > { %v1187_v54 = vadd.f32 %v1186_v58, %v1122_v12  ;;  %v1062_v48 = vpop.f32.mrf.mxu1 }
 0x1b6   : > { %v1063_v11 = vadd.f32 %v1062_v48, %v998_v6 }
 0x1b7   : > { %v1232_v61 = vmul.f32 0.25, %v1187_v54  ;;  %vm1216_vm10 = vcmp.ge.f32.partialorder %v1187_v54, 0.0 }
 0x1b9   : > { %v1248_v4 = vsel %vm1216_vm10, %v1187_v54, %v1232_v61 }
 0x1ba   : > { %v1124_v63 = vpop.f32.mrf.mxu2  ;;  %1318 = vmatmul.f32.gmra.mxu0 %v1248_v4 }
 0x1bb   : > { %v1125_v20 = vadd.f32 %v1124_v63, %v1060_v5 }
 0x1bc   : > { %v1189_v62 = vpop.f32.mrf.mxu3 }
 0x1bd   : > { %v1190_v0 = vadd.f32 %v1189_v62, %v1125_v20  ;;  %v1065_v8 = vpop.f32.mrf.mxu1 }
 0x1be   : > { %v1066_v22 = vadd.f32 %v1065_v8, %v1001_v16 }
 0x1bf   : > { %v1233_v3 = vmul.f32 0.25, %v1190_v0  ;;  %vm1217_vm11 = vcmp.ge.f32.partialorder %v1190_v0, 0.0 }
 0x1c1   : > { %v1249_v47 = vsel %vm1217_vm11, %v1190_v0, %v1233_v3 }
 0x1c2   : > { %v1127_v13 = vpop.f32.mrf.mxu2  ;;  %1321 = vmatmul.f32.gmra.mxu0 %v1249_v47 }
 0x1c3   : > { %v1128_v14 = vadd.f32 %v1127_v13, %v1063_v11 }
 0x1c4   : > { %v1192_v60 = vpop.f32.mrf.mxu3 }
 0x1c5   : > { %v1193_v18 = vadd.f32 %v1192_v60, %v1128_v14  ;;  %v1068_v24 = vpop.f32.mrf.mxu1 }
 0x1c6   : > { %v1069_v9 = vadd.f32 %v1068_v24, %v1004_v19 }
 0x1c7   : > { %v1234_v17 = vmul.f32 0.25, %v1193_v18  ;;  %vm1218_vm12 = vcmp.ge.f32.partialorder %v1193_v18, 0.0 }
 0x1c9   : > { %v1250_v44 = vsel %vm1218_vm12, %v1193_v18, %v1234_v17 }
 0x1ca   : > { %v1130_v25 = vpop.f32.mrf.mxu2  ;;  %1324 = vmatmul.f32.gmra.mxu0 %v1250_v44 }
 0x1cb   : > { %v1131_v10 = vadd.f32 %v1130_v25, %v1066_v22 }
 0x1cc   : > { %v1195_v23 = vpop.f32.mrf.mxu3 }
 0x1cd   : > { %v1196_v27 = vadd.f32 %v1195_v23, %v1131_v10  ;;  %v1071_v34 = vpop.f32.mrf.mxu1 }
 0x1ce   : > { %v1072_v39 = vadd.f32 %v1071_v34, %v1007_v35 }
 0x1cf   : > { %v1235_v30 = vmul.f32 0.25, %v1196_v27  ;;  %vm1219_vm13 = vcmp.ge.f32.partialorder %v1196_v27, 0.0 }
 0x1d1   : > { %v1251_v7 = vsel %vm1219_vm13, %v1196_v27, %v1235_v30 }
 0x1d2   : > { %v1133_v32 = vpop.f32.mrf.mxu2  ;;  %1327 = vmatmul.f32.gmra.mxu0 %v1251_v7 }
 0x1d3   : > { %v1134_v33 = vadd.f32 %v1133_v32, %v1069_v9 }
 0x1d4   : > { %v1198_v36 = vpop.f32.mrf.mxu3 }
 0x1d5   : > { %v1199_v51 = vadd.f32 %v1198_v36, %v1134_v33  ;;  %v1074_v40 = vpop.f32.mrf.mxu1 }
 0x1d6   : > { %v1075_v50 = vadd.f32 %v1074_v40, %v1010_v46 }
 0x1d7   : > { %v1236_v38 = vmul.f32 0.25, %v1199_v51  ;;  %vm1220_vm14 = vcmp.ge.f32.partialorder %v1199_v51, 0.0 }
 0x1d9   : > { %v1252_v28 = vsel %vm1220_vm14, %v1199_v51, %v1236_v38 }
 0x1da   : > { %v1136_v41 = vpop.f32.mrf.mxu2  ;;  %1330 = vmatmul.f32.gmra.mxu0 %v1252_v28 }
 0x1db   : > { %v1137_v42 = vadd.f32 %v1136_v41, %v1072_v39 }
 0x1dc   : > { %v1201_v37 = vpop.f32.mrf.mxu3 }
 0x1dd   : > { %v1202_v45 = vadd.f32 %v1201_v37, %v1137_v42 }
 0x1df   : > { %v1237_v15 = vmul.f32 0.25, %v1202_v45  ;;  %vm1221_vm15 = vcmp.ge.f32.partialorder %v1202_v45, 0.0 }
 0x1e1   : > { %v1253_v53 = vsel %vm1221_vm15, %v1202_v45, %v1237_v15 }
 0x1e2   : > { %v1139_v55 = vpop.f32.mrf.mxu2  ;;  %1333 = vmatmul.f32.gmra.mxu0 %v1253_v53 }
 0x1e3   : > { %v1140_v26 = vadd.f32 %v1139_v55, %v1075_v50 }
 0x1e4   : > { %v1204_v56 = vpop.f32.mrf.mxu3 }
 0x1e5   : > { %v1205_v2 = vadd.f32 %v1204_v56, %v1140_v26 }
 0x1e7   : > { %v1238_v49 = vmul.f32 0.25, %v1205_v2  ;;  %vm1222_vm0 = vcmp.ge.f32.partialorder %v1205_v2, 0.0 }
 0x1e9   : > { %v1254_v52 = vsel %vm1222_vm0, %v1205_v2, %v1238_v49 }
 0x1ea   : > { %1336 = vmatmul.f32.gmra.mxu0 %v1254_v52 }
 0x1ef   : > { %v1292_v12 = vpop.f32.mrf.mxu0 }
 0x1f0   : > { %v1293_v57 = vadd.f32 %v1589_v29, %v1292_v12 }
 0x1f2   : > { %1340 = vst [vmem:[%s2359_s9] sm:$0xff] %v1293_v57 }
 0x1f7   : > { %v1295_v58 = vpop.f32.mrf.mxu0 }
 0x1f8   : > { %v1296_v54 = vadd.f32 %v1589_v29, %v1295_v58 }
 0x1fa   : > { %1341 = vst [vmem:[%s2359_s9 + $0x8] sm:$0xff] %v1296_v54 }
 0x1ff   : > { %v1298_v48 = vpop.f32.mrf.mxu0 }
 0x200   : > { %v1299_v59 = vadd.f32 %v1589_v29, %v1298_v48 }
 0x202   : > { %1342 = vst [vmem:[%s2359_s9 + $0x10] sm:$0xff] %v1299_v59 }
 0x207   : > { %v1301_v61 = vpop.f32.mrf.mxu0 }
 0x208   : > { %v1302_v5 = vadd.f32 %v1589_v29, %v1301_v61 }
 0x20a   : > { %1343 = vst [vmem:[%s2359_s9 + $0x18] sm:$0xff] %v1302_v5 }
 0x20f   : > { %v1304_v4 = vpop.f32.mrf.mxu0 }
 0x210   : > { %v1305_v63 = vadd.f32 %v1589_v29, %v1304_v4 }
 0x212   : > { %1344 = vst [vmem:[%s2359_s9 + $0x20] sm:$0xff] %v1305_v63 }
 0x217   : > { %v1307_v20 = vpop.f32.mrf.mxu0 }
 0x218   : > { %v1308_v62 = vadd.f32 %v1589_v29, %v1307_v20 }
 0x21a   : > { %1345 = vst [vmem:[%s2359_s9 + $0x28] sm:$0xff] %v1308_v62 }
 0x21f   : > { %v1310_v0 = vpop.f32.mrf.mxu0 }
 0x220   : > { %v1311_v1 = vadd.f32 %v1589_v29, %v1310_v0 }
 0x222   : > { %1346 = vst [vmem:[%s2359_s9 + $0x30] sm:$0xff] %v1311_v1 }
 0x227   : > { %v1313_v6 = vpop.f32.mrf.mxu0 }
 0x228   : > { %v1314_v3 = vadd.f32 %v1589_v29, %v1313_v6 }
 0x22a   : > { %1347 = vst [vmem:[%s2359_s9 + $0x38] sm:$0xff] %v1314_v3 }
 0x22f   : > { %v1316_v8 = vpop.f32.mrf.mxu0 }
 0x230   : > { %v1317_v11 = vadd.f32 %v1589_v29, %v1316_v8 }
 0x232   : > { %1348 = vst [vmem:[%s2359_s9 + $0x40] sm:$0xff] %v1317_v11 }
 0x237   : > { %v1319_v47 = vpop.f32.mrf.mxu0 }
 0x238   : > { %v1320_v13 = vadd.f32 %v1589_v29, %v1319_v47 }
 0x23a   : > { %1349 = vst [vmem:[%s2359_s9 + $0x48] sm:$0xff] %v1320_v13 }
 0x23f   : > { %v1322_v14 = vpop.f32.mrf.mxu0 }
 0x240   : > { %v1323_v60 = vadd.f32 %v1589_v29, %v1322_v14 }
 0x242   : > { %1350 = vst [vmem:[%s2359_s9 + $0x50] sm:$0xff] %v1323_v60 }
 0x247   : > { %v1325_v18 = vpop.f32.mrf.mxu0 }
 0x248   : > { %v1326_v16 = vadd.f32 %v1589_v29, %v1325_v18 }
 0x24a   : > { %1351 = vst [vmem:[%s2359_s9 + $0x58] sm:$0xff] %v1326_v16 }
 0x24f   : > { %v1328_v17 = vpop.f32.mrf.mxu0 }
 0x250   : > { %v1329_v21 = vadd.f32 %v1589_v29, %v1328_v17 }
 0x252   : > { %1352 = vst [vmem:[%s2359_s9 + $0x60] sm:$0xff] %v1329_v21 }
 0x257   : > { %v1331_v22 = vpop.f32.mrf.mxu0 }
 0x258   : > { %v1332_v44 = vadd.f32 %v1589_v29, %v1331_v22 }
 0x25a   : > { %1353 = vst [vmem:[%s2359_s9 + $0x68] sm:$0xff] %v1332_v44 }
 0x25f   : > { %v1334_v24 = vpop.f32.mrf.mxu0 }
 0x260   : > { %v1335_v25 = vadd.f32 %v1589_v29, %v1334_v24 }
 0x262   : > { %1354 = vst [vmem:[%s2359_s9 + $0x70] sm:$0xff] %v1335_v25 }
 0x267   : > { %v1337_v10 = vpop.f32.mrf.mxu0 }
 0x268   : > { %v1338_v23 = vadd.f32 %v1589_v29, %v1337_v10 }
 0x26a   : > { %1355 = vst [vmem:[%s2359_s9 + $0x78] sm:$0xff] %v1338_v23 }
 0x26b   : > { %1839 = shalt.err (!%p1836_p8)
}
 0x26c   : > { %s1883_s19 = smov 128   ;;  %s1884_s9 = smov 8  }
 0x26d   : > { %1538 = dma.vmem_to_hbm [thread:$0]  (%p1958_p5), %s1370_s20, 2048, %s1372_s14, %s1357_s15, %s1883_s19, %s1883_s19, %s1884_s9  }
 0x26e PF: > { %p1550_p9 = scmp.ge.s32.totalorder %s1878_s24, 2  ;;  %s1386_s10 = sand.u32 1, %s1866_s21  }
 0x26f   : > { %s1387_s11 = scalar_lea.sflag [#allocation4], %s1386_s10 }
 0x270   : > { %p1545_p10 = pnand %p1550_p9, %p1962_p6 }
 0x272   : > { %p1546_p11 = pneg %p1545_p10 }
 0x274   : > { %1861 = dma.done.wait (%p1546_p11), %s1387_s11, 2048  }
 0x275   : > { %1863 = vsyncadd (%p1546_p11), %s1387_s11, 4294965248  ;;  %p17_p12 = scmp.ge.s32.totalorder %s1945_s27, 4   ;;  %s2420_s21 = smov %s1870_s22 }
 0x276   : > { %s2421_s22 = smov %s1874_s23  ;;  %s2422_s23 = smov %s1956_s30 }
 0x277   : > { %s2423_s24 = smov %s1945_s27  ;;  %19 = sbr.rel (!%p17_p12) target bundleno = 4 (0x4), region = 84 }
 0x27c   :  { %1393 = vsyncpa [#allocation3], 1 }
 0x27d   :  { %1395 = vsyncpa [#allocation3 + $0x1], 1 }
 0x27e   :  { %1396 = vsyncpa [#allocation4], 1 }
 0x27f   :  { %1398 = vsyncpa [#allocation4 + $0x1], 1 }

</bundles_post_ra>
